<compile_context>
chip_gen: v5e
topology: v5e:2x2
jax: 0.10.0
libtpu: 0.0.40
codegen_flags: <defaults>
</compile_context>

<pallas_src>
import functools
import math

import numpy as np
import jax
import jax.numpy as jnp
from jax.experimental import pallas as pl
from jax.experimental.pallas import tpu as pltpu

T = 8              # trajectory length
OBS_DIM = 16       # observation dim
MEM_DIM = 32       # d_model
NHEAD = 4
HEAD_DIM = MEM_DIM // NHEAD
FF_DIM = 2048      # nn.TransformerEncoderLayer default dim_feedforward
EPS = 1e-5
OUT_PAD = 128      # lane-dense output row: cols 0-1 = logits, col 2 = value
IN_FLAT = T * OBS_DIM      # 128 (lane-dense flattened trajectory)
XD = T * MEM_DIM           # 256 (lane-packed activation width, all timesteps)
SCALE = 1.0 / math.sqrt(HEAD_DIM)


def _lane_layout(sizes):
    """Pack named 1-D lane segments, each starting at a 128-lane boundary."""
    layout, off = {}, 0
    for name, size in sizes:
        layout[name] = (off, size)
        off += ((size + 127) // 128) * 128
    return layout, off


# f32 bias / LayerNorm slab, shape (1, VEC_TOTAL)
VEC_LAYOUT, VEC_TOTAL = _lane_layout([
    ("xbias", XD), ("kv_bias", 2 * XD), ("bq_t", XD), ("lin1_b", FF_DIM),
    ("head_b", OUT_PAD), ("bop", MEM_DIM), ("n1w", MEM_DIM), ("n1b", MEM_DIM),
    ("n2w", MEM_DIM), ("n2b", MEM_DIM), ("lin2_b", MEM_DIM)])

# bf16 32-row weight slab, shape (MEM_DIM, W32_TOTAL)
W32_LAYOUT, W32_TOTAL = _lane_layout([
    ("lin1_w", FF_DIM), ("wq_t", XD), ("seg_exp", XD),
    ("head_w", OUT_PAD), ("grp_sum", NHEAD * T)])

# bf16 256-row weight slab, shape (XD, WBIG_TOTAL)
WBIG_LAYOUT, WBIG_TOTAL = _lane_layout([
    ("wkv", 2 * XD), ("seg_score", NHEAD * T), ("wop_t", MEM_DIM)])


def _win(ref, layout, name):
    """Load a named lane segment from a packed slab ref (128-aligned start)."""
    start, size = layout[name]
    stop = min(start + ((size + 127) // 128) * 128, ref.shape[-1])
    return ref[:, start:stop][:, :size]


def _layernorm(x, w, b):
    mean = jnp.mean(x, axis=-1, keepdims=True)
    xc = x - mean
    var = jnp.mean(xc * xc, axis=-1, keepdims=True)
    return xc * jax.lax.rsqrt(var + EPS) * w + b


def policy_kernel(traj_ref, embd_ref, wbig_ref, w32_ref, lin2_ref, vec_ref, out_ref):
    f32, bf16 = jnp.float32, jnp.bfloat16
    vecs = lambda n: _win(vec_ref, VEC_LAYOUT, n)
    w32 = lambda n: _win(w32_ref, W32_LAYOUT, n)
    wbig = lambda n: _win(wbig_ref, WBIG_LAYOUT, n)

    xin = traj_ref[...].astype(bf16)                                   # (BB, 128)

    # ---- embed + positional embedding for all T timesteps (block-diag) ----
    x_flat = jnp.dot(xin, embd_ref[...],
                     preferred_element_type=f32) + vecs("xbias")       # (BB, 256)
    x_bf = x_flat.astype(bf16)
    x_last = x_flat[:, (T - 1) * MEM_DIM:]                             # (BB, 32)

    # ---- K/V for all timesteps (block-diag, fused into one dot) ----
    kv = jnp.dot(x_bf, wbig("wkv"),
                 preferred_element_type=f32) + vecs("kv_bias")         # (BB, 512)
    k_flat = kv[:, :XD]
    v_flat = kv[:, XD:]

    # ---- Q for the last timestep only, pre-tiled over the T lane-blocks ----
    q_t = jnp.dot(x_last.astype(bf16), w32("wq_t"),
                  preferred_element_type=f32) + vecs("bq_t")           # (BB, 256)

    # ---- fused-head attention via 0/1 segment matrices (no per-head loop) ----
    prod = (k_flat * q_t).astype(bf16)                                 # (BB, 256)
    s = jnp.dot(prod, wbig("seg_score"),
                preferred_element_type=f32) * SCALE                    # (BB, 32) lane = h*T + t
    # Per-row global max: constant within each head group -> softmax unchanged.
    s = s - jnp.max(s, axis=-1, keepdims=True)
    p = jnp.exp(s)
    grp = w32("grp_sum").astype(f32)                                   # (32, 32) per-head ones block
    denom = jnp.dot(p, grp, preferred_element_type=f32)                # per-head sums, per lane
    pn = (p / denom).astype(bf16)                                      # exact normalization (no approx recip)
    p_full = jnp.dot(pn, w32("seg_exp"),
                     preferred_element_type=f32)                       # (BB, 256)
    # context + out_proj fused: (p*V) @ tile(W_op, (T, 1))
    attn = jnp.dot((p_full * v_flat).astype(bf16), wbig("wop_t"),
                   preferred_element_type=f32) + vecs("bop")           # (BB, 32)

    # ---- post-norm encoder tail, last timestep only ----
    y = _layernorm(x_last + attn, vecs("n1w"), vecs("n1b"))
    h1 = jnp.dot(y.astype(bf16), w32("lin1_w"),
                 preferred_element_type=f32) + vecs("lin1_b")          # (BB, 2048)
    h1 = jnp.maximum(h1, 0.0)
    h2 = jnp.dot(h1.astype(bf16), lin2_ref[...],
                 preferred_element_type=f32) + vecs("lin2_b")          # (BB, 32)
    z = _layernorm(y + h2, vecs("n2w"), vecs("n2b"))

    # ---- policy/value heads (mem_readout == 0 rows dropped host-side) ----
    head = jnp.dot(z.astype(bf16), w32("head_w"),
                   preferred_element_type=f32) + vecs("head_b")        # (BB, 128)
    out_ref[...] = head


def _round_up(x, m):
    return ((x + m - 1) // m) * m


@functools.partial(jax.jit, static_argnames=("block_b",))
def strategic_memory_policy_forward_batched(trajectories, packed, block_b=256):
    """trajectories: (B, T, OBS_DIM) f32 -> (logits (B, 2), values (B,))."""
    B = trajectories.shape[0]
    traj_flat = trajectories.reshape(B, IN_FLAT).astype(jnp.float32)

    # Batch tile: fill MXU rows (128 is the v5e sweet spot, 256 for v6e/v7x),
    # without over-padding tiny batches. >=2 grid steps use both v7x TCs.
    bb = min(block_b, _round_up(B, 8))
    b_pad = _round_up(B, bb)
    if b_pad != B:
        traj_flat = jnp.pad(traj_flat, ((0, b_pad - B), (0, 0)))
    nsteps = b_pad // bb

    weights = (packed["embed_bd"], packed["wbig"], packed["w32"],
               packed["lin2_w"], packed["vec"])

    in_specs = [pl.BlockSpec((bb, IN_FLAT), lambda i: (i, 0))]
    # constant index maps -> weights DMA'd once, stay VMEM-resident across steps
    in_specs += [pl.BlockSpec(w.shape, lambda i: (0, 0)) for w in weights]
    out_specs = pl.BlockSpec((bb, OUT_PAD), lambda i: (i, 0))

    flops_per_row = 2 * (IN_FLAT * XD + XD * 2 * XD + MEM_DIM * XD + XD * 32
                         + 32 * 32 + 32 * XD + XD * MEM_DIM
                         + MEM_DIM * FF_DIM + FF_DIM * MEM_DIM + MEM_DIM * OUT_PAD)
    weight_bytes = sum(int(w.size) * w.dtype.itemsize for w in weights)
    cost = pl.CostEstimate(
        flops=int(flops_per_row) * b_pad,
        transcendentals=40 * b_pad,
        bytes_accessed=weight_bytes + b_pad * (IN_FLAT + OUT_PAD) * 4)

    out = pl.pallas_call(
        policy_kernel,
        out_shape=jax.ShapeDtypeStruct((b_pad, OUT_PAD), jnp.float32),
        grid_spec=pltpu.PrefetchScalarGridSpec(
            num_scalar_prefetch=0,
            grid=(nsteps,),
            in_specs=in_specs,
            out_specs=out_specs),
        compiler_params=pltpu.CompilerParams(
            dimension_semantics=("parallel",)),
        cost_estimate=cost,
    )(traj_flat, *weights)

    return out[:B, 0:2], out[:B, 2]


def strategic_memory_policy_forward(trajectory, packed):
    """trajectory: (T, OBS_DIM) f32 -> (logits (2,), value (), aux_preds {})."""
    logits, values = strategic_memory_policy_forward_batched(
        trajectory[None], packed, block_b=256)
    return logits[0], values[0], {}   # aux_modules=[] ; dropout identity in eval


# ----------------------------- parameters --------------------------------- #

def init_natural_params(key):
    """Natural (PyTorch-layout, [in, out]-transposed) parameters."""
    ks = jax.random.split(key, 15)

    def w(k, shape, scale=0.05):
        return (scale * jax.random.normal(k, shape)).astype(jnp.float32)

    rb = lambda a: a.astype(jnp.bfloat16).astype(jnp.float32)   # bf16 storage rounding
    nat = {}
    nat["embed_w"] = rb(w(ks[0], (OBS_DIM, MEM_DIM)))
    nat["embed_b"] = w(ks[1], (MEM_DIM,))
    nat["pos"] = w(ks[2], (256, MEM_DIM))[:T]
    in_proj_w = w(ks[3], (MEM_DIM, 3 * MEM_DIM))
    in_proj_b = w(ks[4], (3 * MEM_DIM,))
    nat["wq"] = rb(in_proj_w[:, :MEM_DIM])
    nat["wk"] = rb(in_proj_w[:, MEM_DIM:2 * MEM_DIM])
    nat["wv"] = rb(in_proj_w[:, 2 * MEM_DIM:])
    nat["bq"] = in_proj_b[:MEM_DIM]
    nat["bk"] = in_proj_b[MEM_DIM:2 * MEM_DIM]
    nat["bv"] = in_proj_b[2 * MEM_DIM:]
    nat["out_proj_w"] = rb(w(ks[5], (MEM_DIM, MEM_DIM)))
    nat["out_proj_b"] = w(ks[6], (MEM_DIM,))
    nat["norm1_w"] = jnp.ones((MEM_DIM,), jnp.float32)
    nat["norm1_b"] = jnp.zeros((MEM_DIM,), jnp.float32)
    nat["norm2_w"] = jnp.ones((MEM_DIM,), jnp.float32)
    nat["norm2_b"] = jnp.zeros((MEM_DIM,), jnp.float32)
    nat["lin1_w"] = rb(w(ks[7], (MEM_DIM, FF_DIM), 0.02))
    nat["lin1_b"] = w(ks[8], (FF_DIM,), 0.02)
    nat["lin2_w"] = rb(w(ks[9], (FF_DIM, MEM_DIM), 0.02))
    nat["lin2_b"] = w(ks[10], (MEM_DIM,), 0.02)
    nat["policy_w"] = rb(w(ks[11], (2 * MEM_DIM, 2)))
    nat["policy_b"] = w(ks[12], (2,))
    nat["value_w"] = rb(w(ks[13], (2 * MEM_DIM, 1)))
    nat["value_b"] = w(ks[14], (1,))
    return nat


def pack_params(nat):
    """Pack natural params into the lane-dense slabs consumed by the kernel."""
    f = lambda a: np.asarray(a, np.float32)

    # block-diagonal embed: (T*OBS_DIM, T*MEM_DIM); block-diag fused K|V
    embed_bd = np.zeros((IN_FLAT, XD), np.float32)
    wkv = np.zeros((XD, 2 * XD), np.float32)
    for t in range(T):
        embed_bd[t * OBS_DIM:(t + 1) * OBS_DIM, t * MEM_DIM:(t + 1) * MEM_DIM] = f(nat["embed_w"])
        wkv[t * MEM_DIM:(t + 1) * MEM_DIM, t * MEM_DIM:(t + 1) * MEM_DIM] = f(nat["wk"])
        wkv[t * MEM_DIM:(t + 1) * MEM_DIM, XD + t * MEM_DIM:XD + (t + 1) * MEM_DIM] = f(nat["wv"])

    # attention segment matrices (heads fused, score lane index = h*T + t)
    seg_score = np.zeros((XD, NHEAD * T), np.float32)
    for t in range(T):
        for d in range(MEM_DIM):
            seg_score[t * MEM_DIM + d, (d // HEAD_DIM) * T + t] = 1.0
    grp_sum = np.kron(np.eye(NHEAD, dtype=np.float32), np.ones((T, T), np.float32))
    wop_t = np.tile(f(nat["out_proj_w"]), (T, 1))       # ctx-fold + out_proj fused
    wq_t = np.tile(f(nat["wq"]), (1, T))                 # Q tiled over timesteps

    # heads: memory=None => mem_readout == 0, rows [MEM_DIM:] dropped
    head_w = np.zeros((MEM_DIM, OUT_PAD), np.float32)
    head_w[:, 0:2] = f(nat["policy_w"])[:MEM_DIM]
    head_w[:, 2:3] = f(nat["value_w"])[:MEM_DIM]

    def fill_slab(rows, total, layout, pieces):
        buf = np.zeros((rows, total), np.float32)
        for name, arr in pieces.items():
            start, size = layout[name]
            a = np.asarray(arr, np.float32)
            if a.ndim == 1:
                a = a[None, :]
            assert a.shape == (rows, size), (name, a.shape, (rows, size))
            buf[:, start:start + size] = a
        return buf

    vec = fill_slab(1, VEC_TOTAL, VEC_LAYOUT, {
        "xbias": (f(nat["embed_b"])[None, :] + f(nat["pos"])).reshape(1, XD),
        "kv_bias": np.concatenate([np.tile(f(nat["bk"]), T),
                                   np.tile(f(nat["bv"]), T)])[None, :],
        "bq_t": np.tile(f(nat["bq"]), T)[None, :],
        "lin1_b": f(nat["lin1_b"])[None, :],
        "head_b": np.concatenate([f(nat["policy_b"]), f(nat["value_b"]),
                                  np.zeros(OUT_PAD - 3, np.float32)])[None, :],
        "bop": f(nat["out_proj_b"])[None, :],
        "n1w": f(nat["norm1_w"])[None, :], "n1b": f(nat["norm1_b"])[None, :],
        "n2w": f(nat["norm2_w"])[None, :], "n2b": f(nat["norm2_b"])[None, :],
        "lin2_b": f(nat["lin2_b"])[None, :]})

    w32 = fill_slab(MEM_DIM, W32_TOTAL, W32_LAYOUT, {
        "lin1_w": f(nat["lin1_w"]), "wq_t": wq_t, "seg_exp": seg_score.T,
        "head_w": head_w, "grp_sum": grp_sum})

    wbig = fill_slab(XD, WBIG_TOTAL, WBIG_LAYOUT, {
        "wkv": wkv, "seg_score": seg_score, "wop_t": wop_t})

    return {"embed_bd": jnp.asarray(embed_bd, jnp.bfloat16),
            "wbig": jnp.asarray(wbig, jnp.bfloat16),
            "w32": jnp.asarray(w32, jnp.bfloat16),
            "lin2_w": jnp.asarray(nat["lin2_w"], jnp.bfloat16),
            "vec": jnp.asarray(vec, jnp.float32)}


# ----------------------------- pure-JAX reference -------------------------- #

def reference_forward(trajectories, nat):
    x = jnp.einsum("bto,od->btd", trajectories, nat["embed_w"]) \
        + nat["embed_b"] + nat["pos"][None]
    q = x @ nat["wq"] + nat["bq"]
    k = x @ nat["wk"] + nat["bk"]
    v = x @ nat["wv"] + nat["bv"]
    B = x.shape[0]
    split = lambda a: a.reshape(B, T, NHEAD, HEAD_DIM).transpose(0, 2, 1, 3)
    qh, kh, vh = split(q), split(k), split(v)
    s = jnp.einsum("bhqd,bhkd->bhqk", qh, kh) * SCALE
    p = jax.nn.softmax(s, axis=-1)
    ctx = jnp.einsum("bhqk,bhkd->bhqd", p, vh).transpose(0, 2, 1, 3).reshape(B, T, MEM_DIM)
    attn = ctx @ nat["out_proj_w"] + nat["out_proj_b"]

    def ln(a, w, b):
        mu = a.mean(-1, keepdims=True)
        var = ((a - mu) ** 2).mean(-1, keepdims=True)
        return (a - mu) * jax.lax.rsqrt(var + EPS) * w + b

    y = ln(x + attn, nat["norm1_w"], nat["norm1_b"])
    h = jax.nn.relu(y @ nat["lin1_w"] + nat["lin1_b"])
    z = ln(y + h @ nat["lin2_w"] + nat["lin2_b"], nat["norm2_w"], nat["norm2_b"])
    feat = z[:, -1]
    full = jnp.concatenate([feat, jnp.zeros_like(feat)], axis=-1)
    logits = full @ nat["policy_w"] + nat["policy_b"]
    value = (full @ nat["value_w"] + nat["value_b"])[:, 0]
    return logits, value


if __name__ == "__main__":
    key = jax.random.PRNGKey(0)
    pkey, xkey, bkey = jax.random.split(key, 3)
    nat = init_natural_params(pkey)
    packed = pack_params(nat)

    # single trajectory (module semantics)
    trajectory = jax.random.normal(xkey, (T, OBS_DIM), dtype=jnp.float32)
    logits, value, aux = strategic_memory_policy_forward(trajectory, packed)
    jax.block_until_ready((logits, value))
    assert logits.shape == (2,) and value.shape == () and aux == {}

    # small batch through the same kernel
    batch = jnp.stack([trajectory, 0.5 * trajectory, -trajectory, trajectory + 1.0])
    blogits, bvalues = strategic_memory_policy_forward_batched(batch, packed, block_b=256)
    jax.block_until_ready((blogits, bvalues))
    assert blogits.shape == (4, 2) and bvalues.shape == (4,)
    assert jnp.allclose(blogits[0], logits, atol=1e-5, rtol=1e-5)
    assert jnp.allclose(bvalues[0], value, atol=1e-5, rtol=1e-5)

    # accuracy vs. pure-JAX reference (bf16 weight storage -> loose tolerance)
    rlogits, rvalues = reference_forward(batch, nat)
    assert jnp.allclose(blogits, rlogits, atol=5e-2, rtol=5e-2)
    assert jnp.allclose(bvalues, rvalues, atol=5e-2, rtol=5e-2)

    # larger batch: two 256-row grid steps (both v7x TCs, weights DMA'd once)
    big = jax.random.normal(bkey, (512, T, OBS_DIM), dtype=jnp.float32)
    glogits, gvalues = strategic_memory_policy_forward_batched(big, packed, block_b=256)
    jax.block_until_ready((glogits, gvalues))
    assert glogits.shape == (512, 2) and gvalues.shape == (512,)
    rg_l, rg_v = reference_forward(big[:8], nat)
    assert jnp.allclose(glogits[:8], rg_l, atol=5e-2, rtol=5e-2)
    assert jnp.allclose(gvalues[:8], rg_v, atol=5e-2, rtol=5e-2)

    print("KERNEL_OK")
</pallas_src>

<mosaic_0001>
module attributes {stable_mosaic.version = 11 : i64} {
  func.func @policy_kernel(%arg0: i32, %arg1: memref<8x128xf32, #tpu.memory_space<vmem>>, %arg2: memref<128x256xbf16, #tpu.memory_space<vmem>>, %arg3: memref<256x768xbf16, #tpu.memory_space<vmem>>, %arg4: memref<32x2816xbf16, #tpu.memory_space<vmem>>, %arg5: memref<2048x32xbf16, #tpu.memory_space<vmem>>, %arg6: memref<1x3968xf32, #tpu.memory_space<vmem>>, %arg7: memref<8x128xf32, #tpu.memory_space<vmem>>) attributes {dimension_semantics = [#tpu.dimension_semantics<parallel>], iteration_bounds = array<i64: 1>, scalar_prefetch = 0 : i64, scratch_operands = 0 : i64, tpu.core_type = #tpu.core_type<tc>, window_params = [{transform_indices = @transform_0, window_bounds = array<i64: 8, 128>}, {pipeline_mode = #tpu.pipeline_mode<synchronous>, transform_indices = @transform_1, window_bounds = array<i64: 128, 256>}, {pipeline_mode = #tpu.pipeline_mode<synchronous>, transform_indices = @transform_2, window_bounds = array<i64: 256, 768>}, {pipeline_mode = #tpu.pipeline_mode<synchronous>, transform_indices = @transform_3, window_bounds = array<i64: 32, 2816>}, {pipeline_mode = #tpu.pipeline_mode<synchronous>, transform_indices = @transform_4, window_bounds = array<i64: 2048, 32>}, {pipeline_mode = #tpu.pipeline_mode<synchronous>, transform_indices = @transform_5, window_bounds = array<i64: 1, 3968>}, {transform_indices = @transform_6, window_bounds = array<i64: 8, 128>}]} {
    %c0 = arith.constant 0 : index
    %c0_0 = arith.constant 0 : index
    %0 = vector.load %arg1[%c0, %c0_0] : memref<8x128xf32, #tpu.memory_space<vmem>>, vector<8x128xf32>
    %1 = arith.truncf %0 : vector<8x128xf32> to vector<8x128xbf16>
    %c0_1 = arith.constant 0 : index
    %c0_2 = arith.constant 0 : index
    %2 = vector.load %arg2[%c0_1, %c0_2] : memref<128x256xbf16, #tpu.memory_space<vmem>>, vector<128x256xbf16>
    %cst = arith.constant dense<0.000000e+00> : vector<8x256xf32>
    %3 = tpu.matmul %1, %2, %cst {dimension_numbers = #tpu.dot_dimension_numbers<[1], [0], [0], [1], [0, 0, 1, 1], [], []>} : vector<8x128xbf16>, vector<128x256xbf16>, vector<8x256xf32> -> vector<8x256xf32>
    %c0_3 = arith.constant 0 : index
    %c0_4 = arith.constant 0 : index
    %4 = vector.load %arg6[%c0_3, %c0_4] : memref<1x3968xf32, #tpu.memory_space<vmem>>, vector<1x256xf32>
    %5 = vector.broadcast %4 : vector<1x256xf32> to vector<8x256xf32>
    %6 = arith.addf %3, %5 : vector<8x256xf32>
    %7 = arith.truncf %6 : vector<8x256xf32> to vector<8x256xbf16>
    %8 = vector.extract_strided_slice %6 {offsets = [0, 224], sizes = [8, 32], strides = [1, 1]} : vector<8x256xf32> to vector<8x32xf32>
    %c0_5 = arith.constant 0 : index
    %c0_6 = arith.constant 0 : index
    %9 = vector.load %arg3[%c0_5, %c0_6] : memref<256x768xbf16, #tpu.memory_space<vmem>>, vector<256x512xbf16>
    %cst_7 = arith.constant dense<0.000000e+00> : vector<8x512xf32>
    %10 = tpu.matmul %7, %9, %cst_7 {dimension_numbers = #tpu.dot_dimension_numbers<[1], [0], [0], [1], [0, 0, 1, 1], [], []>} : vector<8x256xbf16>, vector<256x512xbf16>, vector<8x512xf32> -> vector<8x512xf32>
    %c0_8 = arith.constant 0 : index
    %c256 = arith.constant 256 : index
    %11 = vector.load %arg6[%c0_8, %c256] : memref<1x3968xf32, #tpu.memory_space<vmem>>, vector<1x512xf32>
    %12 = vector.broadcast %11 : vector<1x512xf32> to vector<8x512xf32>
    %13 = arith.addf %10, %12 : vector<8x512xf32>
    %14 = vector.extract_strided_slice %13 {offsets = [0, 0], sizes = [8, 256], strides = [1, 1]} : vector<8x512xf32> to vector<8x256xf32>
    %15 = vector.extract_strided_slice %13 {offsets = [0, 256], sizes = [8, 256], strides = [1, 1]} : vector<8x512xf32> to vector<8x256xf32>
    %16 = arith.truncf %8 : vector<8x32xf32> to vector<8x32xbf16>
    %c0_9 = arith.constant 0 : index
    %c2048 = arith.constant 2048 : index
    %17 = vector.load %arg4[%c0_9, %c2048] : memref<32x2816xbf16, #tpu.memory_space<vmem>>, vector<32x256xbf16>
    %cst_10 = arith.constant dense<0.000000e+00> : vector<8x256xf32>
    %18 = tpu.matmul %16, %17, %cst_10 {dimension_numbers = #tpu.dot_dimension_numbers<[1], [0], [0], [1], [0, 0, 1, 1], [], []>} : vector<8x32xbf16>, vector<32x256xbf16>, vector<8x256xf32> -> vector<8x256xf32>
    %c0_11 = arith.constant 0 : index
    %c768 = arith.constant 768 : index
    %19 = vector.load %arg6[%c0_11, %c768] : memref<1x3968xf32, #tpu.memory_space<vmem>>, vector<1x256xf32>
    %20 = vector.broadcast %19 : vector<1x256xf32> to vector<8x256xf32>
    %21 = arith.addf %18, %20 : vector<8x256xf32>
    %22 = arith.mulf %14, %21 : vector<8x256xf32>
    %23 = arith.truncf %22 : vector<8x256xf32> to vector<8x256xbf16>
    %c0_12 = arith.constant 0 : index
    %c512 = arith.constant 512 : index
    %24 = vector.load %arg3[%c0_12, %c512] : memref<256x768xbf16, #tpu.memory_space<vmem>>, vector<256x128xbf16>
    %25 = vector.extract_strided_slice %24 {offsets = [0, 0], sizes = [256, 32], strides = [1, 1]} : vector<256x128xbf16> to vector<256x32xbf16>
    %cst_13 = arith.constant dense<0.000000e+00> : vector<8x32xf32>
    %26 = tpu.matmul %23, %25, %cst_13 {dimension_numbers = #tpu.dot_dimension_numbers<[1], [0], [0], [1], [0, 0, 1, 1], [], []>} : vector<8x256xbf16>, vector<256x32xbf16>, vector<8x32xf32> -> vector<8x32xf32>
    %cst_14 = arith.constant 0.353553385 : f32
    %27 = vector.broadcast %cst_14 : f32 to vector<8x32xf32>
    %28 = arith.mulf %26, %27 : vector<8x32xf32>
    %cst_15 = arith.constant dense<0xFF800000> : vector<8xf32>
    %29 = vector.multi_reduction <maximumf>, %28, %cst_15 [1] : vector<8x32xf32> to vector<8xf32>
    %30 = vector.shape_cast %29 : vector<8xf32> to vector<8x1xf32>
    %31 = vector.broadcast %30 : vector<8x1xf32> to vector<8x32xf32>
    %32 = arith.subf %28, %31 : vector<8x32xf32>
    %33 = math.exp %32 : vector<8x32xf32>
    %c0_16 = arith.constant 0 : index
    %c2688 = arith.constant 2688 : index
    %34 = vector.load %arg4[%c0_16, %c2688] : memref<32x2816xbf16, #tpu.memory_space<vmem>>, vector<32x128xbf16>
    %35 = vector.extract_strided_slice %34 {offsets = [0, 0], sizes = [32, 32], strides = [1, 1]} : vector<32x128xbf16> to vector<32x32xbf16>
    %36 = arith.extf %35 : vector<32x32xbf16> to vector<32x32xf32>
    %cst_17 = arith.constant dense<0.000000e+00> : vector<8x32xf32>
    %37 = tpu.matmul %33, %36, %cst_17 {dimension_numbers = #tpu.dot_dimension_numbers<[1], [0], [0], [1], [0, 0, 1, 1], [], []>} : vector<8x32xf32>, vector<32x32xf32>, vector<8x32xf32> -> vector<8x32xf32>
    %38 = arith.divf %33, %37 : vector<8x32xf32>
    %39 = arith.truncf %38 : vector<8x32xf32> to vector<8x32xbf16>
    %c0_18 = arith.constant 0 : index
    %c2304 = arith.constant 2304 : index
    %40 = vector.load %arg4[%c0_18, %c2304] : memref<32x2816xbf16, #tpu.memory_space<vmem>>, vector<32x256xbf16>
    %cst_19 = arith.constant dense<0.000000e+00> : vector<8x256xf32>
    %41 = tpu.matmul %39, %40, %cst_19 {dimension_numbers = #tpu.dot_dimension_numbers<[1], [0], [0], [1], [0, 0, 1, 1], [], []>} : vector<8x32xbf16>, vector<32x256xbf16>, vector<8x256xf32> -> vector<8x256xf32>
    %42 = arith.mulf %41, %15 : vector<8x256xf32>
    %43 = arith.truncf %42 : vector<8x256xf32> to vector<8x256xbf16>
    %c0_20 = arith.constant 0 : index
    %c640 = arith.constant 640 : index
    %44 = vector.load %arg3[%c0_20, %c640] : memref<256x768xbf16, #tpu.memory_space<vmem>>, vector<256x128xbf16>
    %45 = vector.extract_strided_slice %44 {offsets = [0, 0], sizes = [256, 32], strides = [1, 1]} : vector<256x128xbf16> to vector<256x32xbf16>
    %cst_21 = arith.constant dense<0.000000e+00> : vector<8x32xf32>
    %46 = tpu.matmul %43, %45, %cst_21 {dimension_numbers = #tpu.dot_dimension_numbers<[1], [0], [0], [1], [0, 0, 1, 1], [], []>} : vector<8x256xbf16>, vector<256x32xbf16>, vector<8x32xf32> -> vector<8x32xf32>
    %c0_22 = arith.constant 0 : index
    %c3200 = arith.constant 3200 : index
    %47 = vector.load %arg6[%c0_22, %c3200] : memref<1x3968xf32, #tpu.memory_space<vmem>>, vector<1x128xf32>
    %48 = vector.extract_strided_slice %47 {offsets = [0, 0], sizes = [1, 32], strides = [1, 1]} : vector<1x128xf32> to vector<1x32xf32>
    %49 = vector.broadcast %48 : vector<1x32xf32> to vector<8x32xf32>
    %50 = arith.addf %46, %49 : vector<8x32xf32>
    %51 = arith.addf %8, %50 : vector<8x32xf32>
    %c0_23 = arith.constant 0 : index
    %c3328 = arith.constant 3328 : index
    %52 = vector.load %arg6[%c0_23, %c3328] : memref<1x3968xf32, #tpu.memory_space<vmem>>, vector<1x128xf32>
    %53 = vector.extract_strided_slice %52 {offsets = [0, 0], sizes = [1, 32], strides = [1, 1]} : vector<1x128xf32> to vector<1x32xf32>
    %c0_24 = arith.constant 0 : index
    %c3456 = arith.constant 3456 : index
    %54 = vector.load %arg6[%c0_24, %c3456] : memref<1x3968xf32, #tpu.memory_space<vmem>>, vector<1x128xf32>
    %55 = vector.extract_strided_slice %54 {offsets = [0, 0], sizes = [1, 32], strides = [1, 1]} : vector<1x128xf32> to vector<1x32xf32>
    %cst_25 = arith.constant dense<0.000000e+00> : vector<8xf32>
    %56 = vector.multi_reduction <add>, %51, %cst_25 [1] : vector<8x32xf32> to vector<8xf32>
    %57 = vector.shape_cast %56 : vector<8xf32> to vector<8x1xf32>
    %cst_26 = arith.constant 3.200000e+01 : f32
    %58 = vector.broadcast %cst_26 : f32 to vector<8x1xf32>
    %59 = arith.divf %57, %58 : vector<8x1xf32>
    %60 = vector.broadcast %59 : vector<8x1xf32> to vector<8x32xf32>
    %61 = arith.subf %51, %60 : vector<8x32xf32>
    %62 = arith.mulf %61, %61 : vector<8x32xf32>
    %cst_27 = arith.constant dense<0.000000e+00> : vector<8xf32>
    %63 = vector.multi_reduction <add>, %62, %cst_27 [1] : vector<8x32xf32> to vector<8xf32>
    %64 = vector.shape_cast %63 : vector<8xf32> to vector<8x1xf32>
    %cst_28 = arith.constant 3.200000e+01 : f32
    %65 = vector.broadcast %cst_28 : f32 to vector<8x1xf32>
    %66 = arith.divf %64, %65 : vector<8x1xf32>
    %cst_29 = arith.constant 9.99999974E-6 : f32
    %67 = vector.broadcast %cst_29 : f32 to vector<8x1xf32>
    %68 = arith.addf %66, %67 : vector<8x1xf32>
    %69 = math.rsqrt %68 : vector<8x1xf32>
    %70 = vector.broadcast %69 : vector<8x1xf32> to vector<8x32xf32>
    %71 = arith.mulf %61, %70 : vector<8x32xf32>
    %72 = vector.broadcast %53 : vector<1x32xf32> to vector<8x32xf32>
    %73 = arith.mulf %71, %72 : vector<8x32xf32>
    %74 = vector.broadcast %55 : vector<1x32xf32> to vector<8x32xf32>
    %75 = arith.addf %73, %74 : vector<8x32xf32>
    %76 = arith.truncf %75 : vector<8x32xf32> to vector<8x32xbf16>
    %c0_30 = arith.constant 0 : index
    %c0_31 = arith.constant 0 : index
    %77 = vector.load %arg4[%c0_30, %c0_31] : memref<32x2816xbf16, #tpu.memory_space<vmem>>, vector<32x2048xbf16>
    %cst_32 = arith.constant dense<0.000000e+00> : vector<8x2048xf32>
    %78 = tpu.matmul %76, %77, %cst_32 {dimension_numbers = #tpu.dot_dimension_numbers<[1], [0], [0], [1], [0, 0, 1, 1], [], []>} : vector<8x32xbf16>, vector<32x2048xbf16>, vector<8x2048xf32> -> vector<8x2048xf32>
    %c0_33 = arith.constant 0 : index
    %c1024 = arith.constant 1024 : index
    %79 = vector.load %arg6[%c0_33, %c1024] : memref<1x3968xf32, #tpu.memory_space<vmem>>, vector<1x2048xf32>
    %80 = vector.broadcast %79 : vector<1x2048xf32> to vector<8x2048xf32>
    %81 = arith.addf %78, %80 : vector<8x2048xf32>
    %cst_34 = arith.constant 0.000000e+00 : f32
    %82 = vector.broadcast %cst_34 : f32 to vector<8x2048xf32>
    %83 = arith.maximumf %81, %82 : vector<8x2048xf32>
    %84 = arith.truncf %83 : vector<8x2048xf32> to vector<8x2048xbf16>
    %c0_35 = arith.constant 0 : index
    %c0_36 = arith.constant 0 : index
    %85 = vector.load %arg5[%c0_35, %c0_36] : memref<2048x32xbf16, #tpu.memory_space<vmem>>, vector<2048x32xbf16>
    %cst_37 = arith.constant dense<0.000000e+00> : vector<8x32xf32>
    %86 = tpu.matmul %84, %85, %cst_37 {dimension_numbers = #tpu.dot_dimension_numbers<[1], [0], [0], [1], [0, 0, 1, 1], [], []>} : vector<8x2048xbf16>, vector<2048x32xbf16>, vector<8x32xf32> -> vector<8x32xf32>
    %c0_38 = arith.constant 0 : index
    %c3840 = arith.constant 3840 : index
    %87 = vector.load %arg6[%c0_38, %c3840] : memref<1x3968xf32, #tpu.memory_space<vmem>>, vector<1x128xf32>
    %88 = vector.extract_strided_slice %87 {offsets = [0, 0], sizes = [1, 32], strides = [1, 1]} : vector<1x128xf32> to vector<1x32xf32>
    %89 = vector.broadcast %88 : vector<1x32xf32> to vector<8x32xf32>
    %90 = arith.addf %86, %89 : vector<8x32xf32>
    %91 = arith.addf %75, %90 : vector<8x32xf32>
    %c0_39 = arith.constant 0 : index
    %c3584 = arith.constant 3584 : index
    %92 = vector.load %arg6[%c0_39, %c3584] : memref<1x3968xf32, #tpu.memory_space<vmem>>, vector<1x128xf32>
    %93 = vector.extract_strided_slice %92 {offsets = [0, 0], sizes = [1, 32], strides = [1, 1]} : vector<1x128xf32> to vector<1x32xf32>
    %c0_40 = arith.constant 0 : index
    %c3712 = arith.constant 3712 : index
    %94 = vector.load %arg6[%c0_40, %c3712] : memref<1x3968xf32, #tpu.memory_space<vmem>>, vector<1x128xf32>
    %95 = vector.extract_strided_slice %94 {offsets = [0, 0], sizes = [1, 32], strides = [1, 1]} : vector<1x128xf32> to vector<1x32xf32>
    %cst_41 = arith.constant dense<0.000000e+00> : vector<8xf32>
    %96 = vector.multi_reduction <add>, %91, %cst_41 [1] : vector<8x32xf32> to vector<8xf32>
    %97 = vector.shape_cast %96 : vector<8xf32> to vector<8x1xf32>
    %cst_42 = arith.constant 3.200000e+01 : f32
    %98 = vector.broadcast %cst_42 : f32 to vector<8x1xf32>
    %99 = arith.divf %97, %98 : vector<8x1xf32>
    %100 = vector.broadcast %99 : vector<8x1xf32> to vector<8x32xf32>
    %101 = arith.subf %91, %100 : vector<8x32xf32>
    %102 = arith.mulf %101, %101 : vector<8x32xf32>
    %cst_43 = arith.constant dense<0.000000e+00> : vector<8xf32>
    %103 = vector.multi_reduction <add>, %102, %cst_43 [1] : vector<8x32xf32> to vector<8xf32>
    %104 = vector.shape_cast %103 : vector<8xf32> to vector<8x1xf32>
    %cst_44 = arith.constant 3.200000e+01 : f32
    %105 = vector.broadcast %cst_44 : f32 to vector<8x1xf32>
    %106 = arith.divf %104, %105 : vector<8x1xf32>
    %cst_45 = arith.constant 9.99999974E-6 : f32
    %107 = vector.broadcast %cst_45 : f32 to vector<8x1xf32>
    %108 = arith.addf %106, %107 : vector<8x1xf32>
    %109 = math.rsqrt %108 : vector<8x1xf32>
    %110 = vector.broadcast %109 : vector<8x1xf32> to vector<8x32xf32>
    %111 = arith.mulf %101, %110 : vector<8x32xf32>
    %112 = vector.broadcast %93 : vector<1x32xf32> to vector<8x32xf32>
    %113 = arith.mulf %111, %112 : vector<8x32xf32>
    %114 = vector.broadcast %95 : vector<1x32xf32> to vector<8x32xf32>
    %115 = arith.addf %113, %114 : vector<8x32xf32>
    %116 = arith.truncf %115 : vector<8x32xf32> to vector<8x32xbf16>
    %c0_46 = arith.constant 0 : index
    %c2560 = arith.constant 2560 : index
    %117 = vector.load %arg4[%c0_46, %c2560] : memref<32x2816xbf16, #tpu.memory_space<vmem>>, vector<32x128xbf16>
    %cst_47 = arith.constant dense<0.000000e+00> : vector<8x128xf32>
    %118 = tpu.matmul %116, %117, %cst_47 {dimension_numbers = #tpu.dot_dimension_numbers<[1], [0], [0], [1], [0, 0, 1, 1], [], []>} : vector<8x32xbf16>, vector<32x128xbf16>, vector<8x128xf32> -> vector<8x128xf32>
    %c0_48 = arith.constant 0 : index
    %c3072 = arith.constant 3072 : index
    %119 = vector.load %arg6[%c0_48, %c3072] : memref<1x3968xf32, #tpu.memory_space<vmem>>, vector<1x128xf32>
    %120 = vector.broadcast %119 : vector<1x128xf32> to vector<8x128xf32>
    %121 = arith.addf %118, %120 : vector<8x128xf32>
    %c0_49 = arith.constant 0 : index
    %c0_50 = arith.constant 0 : index
    %122 = vector.load %arg7[%c0_49, %c0_50] : memref<8x128xf32, #tpu.memory_space<vmem>>, vector<8x128xf32>
    tpu.vector_store %arg7[%c0_49, %c0_50], %121 {strides = array<i32>} : memref<8x128xf32, #tpu.memory_space<vmem>>, vector<8x128xf32>,
    return
  }
  func.func @transform_0(%arg0: i32) -> (i32, i32) {
    %c0_i32 = arith.constant 0 : i32
    %c0_i32_0 = arith.constant 0 : i32
    return %arg0, %c0_i32 : i32, i32
  }
  func.func @transform_1(%arg0: i32) -> (i32, i32) {
    %c0_i32 = arith.constant 0 : i32
    %c0_i32_0 = arith.constant 0 : i32
    %c0_i32_1 = arith.constant 0 : i32
    return %c0_i32, %c0_i32_0 : i32, i32
  }
  func.func @transform_2(%arg0: i32) -> (i32, i32) {
    %c0_i32 = arith.constant 0 : i32
    %c0_i32_0 = arith.constant 0 : i32
    %c0_i32_1 = arith.constant 0 : i32
    return %c0_i32, %c0_i32_0 : i32, i32
  }
  func.func @transform_3(%arg0: i32) -> (i32, i32) {
    %c0_i32 = arith.constant 0 : i32
    %c0_i32_0 = arith.constant 0 : i32
    %c0_i32_1 = arith.constant 0 : i32
    return %c0_i32, %c0_i32_0 : i32, i32
  }
  func.func @transform_4(%arg0: i32) -> (i32, i32) {
    %c0_i32 = arith.constant 0 : i32
    %c0_i32_0 = arith.constant 0 : i32
    %c0_i32_1 = arith.constant 0 : i32
    return %c0_i32, %c0_i32_0 : i32, i32
  }
  func.func @transform_5(%arg0: i32) -> (i32, i32) {
    %c0_i32 = arith.constant 0 : i32
    %c0_i32_0 = arith.constant 0 : i32
    %c0_i32_1 = arith.constant 0 : i32
    return %c0_i32, %c0_i32_0 : i32, i32
  }
  func.func @transform_6(%arg0: i32) -> (i32, i32) {
    %c0_i32 = arith.constant 0 : i32
    %c0_i32_0 = arith.constant 0 : i32
    return %arg0, %c0_i32 : i32, i32
  }
}

</mosaic_0001>

<bundles_post_ra>
// kernel: strategic_memory_policy_forward_batched.1
= control target key start
LH: loop header
LB: loop body
LE: loop exit
PB: predicated region body
PF: predicated region fallthrough
CT: control target
= control target key end

     0   :  { %s4457_s7 = smov 32   ;;  %vm687_vm0 = vcmask 261120   ;;  %s5985_s1 = inlined_call_operand.vmem [shape: bf16[128,256], index: 1, kind: input, shape index: {}]   ;;  %s5986_s2 = inlined_call_operand.vmem [shape: bf16[256,768], index: 2, kind: input, shape index: {}]   ;;  %s5987_s0 = inlined_call_operand.vmem [shape: f32[8,128], index: 0, kind: input, shape index: {}]   ;;  %s5988_s5 = inlined_call_operand.vmem [shape: f32[1,3968], index: 5, kind: input, shape index: {}]   ;;  %s5989_s3 = inlined_call_operand.vmem [shape: bf16[32,2816], index: 3, kind: input, shape index: {}]   ;;  %s5990_s4 = inlined_call_operand.vmem [shape: bf16[2048,32], index: 4, kind: input, shape index: {}]   ;;  %s5991_s6 = inlined_call_operand.vmem [shape: f32[8,128], index: 6, kind: output, shape index: {}]  }
   0x1   :  { %v3063_v0 = vld [vmem:[%s5985_s1 + $0x70] sm:$0xf]  ;;  %v4170_v1 = vld [vmem:[%s5985_s1 + $0x74] sm:$0xf0]  ;;  %v4169_v2 = vld [vmem:[%s5985_s1 + $0x74] sm:$0xf] }
   0x2   :  { %v3064_v3 = vor.u32 %v4170_v1, %v3063_v0  ;;  %v3065_v4 = vld [vmem:[%s5985_s1 + $0x78] sm:$0xf0]  ;;  %v3055_v5 = vld [vmem:[%s5985_s1 + $0x60] sm:$0xf]  ;;  %v4168_v6 = vld [vmem:[%s5985_s1 + $0x64] sm:$0xf0] }
   0x3   :  { %v3068_v7 = vor.u32 %v4169_v2, %v3065_v4  ;;  %v4167_v8 = vld [vmem:[%s5985_s1 + $0x64] sm:$0xf]  ;;  %v3057_v9 = vld [vmem:[%s5985_s1 + $0x68] sm:$0xf0]  ;;  %v3056_v10 = vor.u32 %v4168_v6, %v3055_v5  ;;  %v3047_v12 = vld [vmem:[%s5985_s1 + $0x50] sm:$0xf] }
   0x4   :  { %128 = vmatpush.bf16.msra.mxu0 %v3064_v3  ;;  %v3060_v11 = vor.u32 %v4167_v8, %v3057_v9  ;;  %v4166_v13 = vld [vmem:[%s5985_s1 + $0x54] sm:$0xf0]  ;;  %v4165_v14 = vld [vmem:[%s5985_s1 + $0x54] sm:$0xf]  ;;  %v3049_v15 = vld [vmem:[%s5985_s1 + $0x58] sm:$0xf0] }
   0x5   :  { %141 = vmatpush.bf16.msra.mxu1 %v3068_v7  ;;  %v3048_v16 = vor.u32 %v4166_v13, %v3047_v12  ;;  %v3052_v17 = vor.u32 %v4165_v14, %v3049_v15  ;;  %v3039_v18 = vld [vmem:[%s5985_s1 + $0x40] sm:$0xf]  ;;  %v4164_v19 = vld [vmem:[%s5985_s1 + $0x44] sm:$0xf0]  ;;  %v4163_v20 = vld [vmem:[%s5985_s1 + $0x44] sm:$0xf] }
   0x6   :  { %v3041_v21 = vld [vmem:[%s5985_s1 + $0x48] sm:$0xf0]  ;;  %v3040_v22 = vor.u32 %v4164_v19, %v3039_v18  ;;  %v3183_v23 = vld [vmem:[%s5986_s2 + $0x150] sm:$0xf]  ;;  %v4201_v24 = vld [vmem:[%s5986_s2 + $0x164] sm:$0xf0] }
   0x7   :  { %v3311_v25 = vld [vmem:[%s5986_s2 + $0x2d0] sm:$0xf]  ;;  %v3044_v26 = vor.u32 %v4163_v20, %v3041_v21  ;;  %v4162_v28 = vld [vmem:[%s5985_s1 + $0x34] sm:$0xf0]  ;;  %v3184_v29 = vor.u32 %v4201_v24, %v3183_v23  ;;  %v4233_v30 = vld [vmem:[%s5986_s2 + $0x2e4] sm:$0xf0] }
   0x8   :  { %129 = vmatpush.bf16.msra.mxu0 %v3056_v10  ;;  %v3031_v27 = vld [vmem:[%s5985_s1 + $0x30] sm:$0xf]  ;;  %v4161_v31 = vld [vmem:[%s5985_s1 + $0x34] sm:$0xf]  ;;  %v3033_v32 = vld [vmem:[%s5985_s1 + $0x38] sm:$0xf0]  ;;  %v3312_v33 = vor.u32 %v4233_v30, %v3311_v25 }
   0x9   :  { %142 = vmatpush.bf16.msra.mxu1 %v3060_v11  ;;  %v3167_v34 = vld [vmem:[%s5986_s2 + $0x120] sm:$0xf]  ;;  %550 = vmatpush.bf16.msra.mxu2 %v3184_v29  ;;  %v4197_v35 = vld [vmem:[%s5986_s2 + $0x134] sm:$0xf0]  ;;  %v3032_v38 = vor.u32 %v4162_v28, %v3031_v27  ;;  %v4160_v40 = vld [vmem:[%s5985_s1 + $0x24] sm:$0xf0]  ;;  %v3036_v43 = vor.u32 %v4161_v31, %v3033_v32 }
   0xa   :  { %v3295_v36 = vld [vmem:[%s5986_s2 + $0x2a0] sm:$0xf]  ;;  %v4229_v37 = vld [vmem:[%s5986_s2 + $0x2b4] sm:$0xf0]  ;;  %563 = vmatpush.bf16.msra.mxu3 %v3312_v33  ;;  %v3168_v41 = vor.u32 %v4197_v35, %v3167_v34  ;;  %v4159_v44 = vld [vmem:[%s5985_s1 + $0x24] sm:$0xf] }
   0xb   :  { %v3023_v39 = vld [vmem:[%s5985_s1 + $0x20] sm:$0xf]  ;;  %v3296_v42 = vor.u32 %v4229_v37, %v3295_v36  ;;  %v3151_v45 = vld [vmem:[%s5986_s2 + $0xf0] sm:$0xf]  ;;  %v4193_v46 = vld [vmem:[%s5986_s2 + $0x104] sm:$0xf0] }
   0xc   :  { %130 = vmatpush.bf16.msra.mxu0 %v3048_v16  ;;  %v3025_v47 = vld [vmem:[%s5985_s1 + $0x28] sm:$0xf0]  ;;  %v3279_v48 = vld [vmem:[%s5986_s2 + $0x270] sm:$0xf]  ;;  %v4225_v49 = vld [vmem:[%s5986_s2 + $0x284] sm:$0xf0]  ;;  %v3152_v50 = vor.u32 %v4193_v46, %v3151_v45  ;;  %v3024_v51 = vor.u32 %v4160_v40, %v3023_v39 }
   0xd   :  { %143 = vmatpush.bf16.msra.mxu1 %v3052_v17  ;;  %551 = vmatpush.bf16.msra.mxu2 %v3168_v41  ;;  %v3015_v52 = vld [vmem:[%s5985_s1 + $0x10] sm:$0xf]  ;;  %v3280_v53 = vor.u32 %v4225_v49, %v3279_v48  ;;  %v3135_v54 = vld [vmem:[%s5986_s2 + $0xc0] sm:$0xf]  ;;  %v4189_v55 = vld [vmem:[%s5986_s2 + $0xd4] sm:$0xf0]  ;;  %v3028_v56 = vor.u32 %v4159_v44, %v3025_v47 }
   0xe   :  { %564 = vmatpush.bf16.msra.mxu3 %v3296_v42  ;;  %v4158_v57 = vld [vmem:[%s5985_s1 + $0x14] sm:$0xf0]  ;;  %v3263_v58 = vld [vmem:[%s5986_s2 + $0x240] sm:$0xf]  ;;  %v4157_v60 = vld [vmem:[%s5985_s1 + $0x14] sm:$0xf]  ;;  %v3136_v63 = vor.u32 %v4189_v55, %v3135_v54 }
   0xf   :  { %v4221_v59 = vld [vmem:[%s5986_s2 + $0x254] sm:$0xf0]  ;;  %v3017_v61 = vld [vmem:[%s5985_s1 + $0x18] sm:$0xf0]  ;;  %v3007_v62 = vld [vmem:[%s5985_s1] sm:$0xf]  ;;  %v3016_v0 = vor.u32 %v4158_v57, %v3015_v52 }
  0x10   :  { %131 = vmatpush.bf16.msra.mxu0 %v3040_v22  ;;  %v4156_v1 = vld [vmem:[%s5985_s1 + $0x4] sm:$0xf0]  ;;  %v3264_v2 = vor.u32 %v4221_v59, %v3263_v58  ;;  %v3119_v3 = vld [vmem:[%s5986_s2 + $0x90] sm:$0xf]  ;;  %v3020_v5 = vor.u32 %v4157_v60, %v3017_v61  ;;  %v4155_v6 = vld [vmem:[%s5985_s1 + $0x4] sm:$0xf] }
  0x11   :  { %144 = vmatpush.bf16.msra.mxu1 %v3044_v26  ;;  %552 = vmatpush.bf16.msra.mxu2 %v3152_v50  ;;  %v4185_v4 = vld [vmem:[%s5986_s2 + $0xa4] sm:$0xf0]  ;;  %v3247_v7 = vld [vmem:[%s5986_s2 + $0x210] sm:$0xf]  ;;  %v3009_v9 = vld [vmem:[%s5985_s1 + $0x8] sm:$0xf0]  ;;  %v3008_v15 = vor.u32 %v4156_v1, %v3007_v62 }
  0x12   :  { %565 = vmatpush.bf16.msra.mxu3 %v3280_v53  ;;  %v4217_v8 = vld [vmem:[%s5986_s2 + $0x224] sm:$0xf0]  ;;  %v4199_v10 = vld [vmem:[%s5986_s2 + $0x154] sm:$0xf]  ;;  %v3185_v11 = vld [vmem:[%s5986_s2 + $0x168] sm:$0xf0]  ;;  %v3120_v14 = vor.u32 %v4185_v4, %v3119_v3  ;;  %v3012_v20 = vor.u32 %v4155_v6, %v3009_v9 }
  0x13   :  { %v4231_v12 = vld [vmem:[%s5986_s2 + $0x2d4] sm:$0xf]  ;;  %v3313_v13 = vld [vmem:[%s5986_s2 + $0x2e8] sm:$0xf0]  ;;  %v24_v16 = vld [vmem:[%s5987_s0] sm:$0xff]  ;;  %v3248_v17 = vor.u32 %v4217_v8, %v3247_v7  ;;  %v3188_v21 = vor.u32 %v4199_v10, %v3185_v11 }
  0x14   :  { %132 = vmatpush.bf16.msra.mxu0 %v3032_v38  ;;  %v3103_v18 = vld [vmem:[%s5986_s2 + $0x60] sm:$0xf]  ;;  %v4181_v19 = vld [vmem:[%s5986_s2 + $0x74] sm:$0xf0]  ;;  %v3316_v24 = vor.u32 %v4231_v12, %v3313_v13  ;;  %v4195_v25 = vld [vmem:[%s5986_s2 + $0x124] sm:$0xf]  ;;  %v25_v27 = vpack.c.bf16 %v24_v16, %v24_v16 }
  0x15   :  { %145 = vmatpush.bf16.msra.mxu1 %v3036_v43  ;;  %553 = vmatpush.bf16.msra.mxu2 %v3136_v63  ;;  %v3231_v22 = vld [vmem:[%s5986_s2 + $0x1e0] sm:$0xf]  ;;  %v4213_v23 = vld [vmem:[%s5986_s2 + $0x1f4] sm:$0xf0]  ;;  %v3169_v26 = vld [vmem:[%s5986_s2 + $0x138] sm:$0xf0]  ;;  %v3104_v30 = vor.u32 %v4181_v19, %v3103_v18 }
  0x16   :  { %566 = vmatpush.bf16.msra.mxu3 %v3264_v2  ;;  %v4227_v28 = vld [vmem:[%s5986_s2 + $0x2a4] sm:$0xf]  ;;  %v3297_v29 = vld [vmem:[%s5986_s2 + $0x2b8] sm:$0xf0]  ;;  %v3232_v31 = vor.u32 %v4213_v23, %v3231_v22  ;;  %v3087_v32 = vld [vmem:[%s5986_s2 + $0x30] sm:$0xf]  ;;  %v3172_v34 = vor.u32 %v4195_v25, %v3169_v26 }
  0x17   :  { %v4177_v33 = vld [vmem:[%s5986_s2 + $0x44] sm:$0xf0]  ;;  %v3215_v35 = vld [vmem:[%s5986_s2 + $0x1b0] sm:$0xf]  ;;  %v3300_v37 = vor.u32 %v4227_v28, %v3297_v29  ;;  %v4191_v38 = vld [vmem:[%s5986_s2 + $0xf4] sm:$0xf] }
  0x18   :  { %133 = vmatpush.bf16.msra.mxu0 %v3024_v51  ;;  %v4209_v36 = vld [vmem:[%s5986_s2 + $0x1c4] sm:$0xf0]  ;;  %v3153_v39 = vld [vmem:[%s5986_s2 + $0x108] sm:$0xf0]  ;;  %v4223_v40 = vld [vmem:[%s5986_s2 + $0x274] sm:$0xf]  ;;  %v3088_v42 = vor.u32 %v4177_v33, %v3087_v32 }
  0x19   :  { %146 = vmatpush.bf16.msra.mxu1 %v3028_v56  ;;  %554 = vmatpush.bf16.msra.mxu2 %v3120_v14  ;;  %v3281_v41 = vld [vmem:[%s5986_s2 + $0x288] sm:$0xf0]  ;;  %v4187_v43 = vld [vmem:[%s5986_s2 + $0xc4] sm:$0xf]  ;;  %v3216_v44 = vor.u32 %v4209_v36, %v3215_v35  ;;  %v3071_v45 = vld [vmem:[%s5986_s2] sm:$0xf]  ;;  %v3156_v48 = vor.u32 %v4191_v38, %v3153_v39 }
  0x1a   :  { %567 = vmatpush.bf16.msra.mxu3 %v3248_v17  ;;  %v4173_v46 = vld [vmem:[%s5986_s2 + $0x14] sm:$0xf0]  ;;  %v3199_v47 = vld [vmem:[%s5986_s2 + $0x180] sm:$0xf]  ;;  %v4202_v51 = vld [vmem:[%s5986_s2 + $0x16c] sm:$0xf0]  ;;  %v3284_v52 = vor.u32 %v4223_v40, %v3281_v41 }
  0x1b   :  { %v4205_v49 = vld [vmem:[%s5986_s2 + $0x194] sm:$0xf0]  ;;  %v3137_v53 = vld [vmem:[%s5986_s2 + $0xd8] sm:$0xf0]  ;;  %v4234_v55 = vld [vmem:[%s5986_s2 + $0x2ec] sm:$0xf0]  ;;  %v3072_v58 = vor.u32 %v4173_v46, %v3071_v45 }
  0x1c   :  { %134 = vmatpush.bf16.msra.mxu0 %v3016_v0  ;;  %v3191_v50 = vld [vmem:[%s5986_s2 + $0x158] sm:$0xf]  ;;  %v4219_v56 = vld [vmem:[%s5986_s2 + $0x244] sm:$0xf]  ;;  %v3265_v57 = vld [vmem:[%s5986_s2 + $0x258] sm:$0xf0]  ;;  %v3200_v61 = vor.u32 %v4205_v49, %v3199_v47  ;;  %v3140_v63 = vor.u32 %v4187_v43, %v3137_v53 }
  0x1d   :  { %147 = vmatpush.bf16.msra.mxu1 %v3020_v5  ;;  %555 = vmatpush.bf16.msra.mxu2 %v3104_v30  ;;  %v3319_v54 = vld [vmem:[%s5986_s2 + $0x2d8] sm:$0xf]  ;;  %v4183_v59 = vld [vmem:[%s5986_s2 + $0x94] sm:$0xf]  ;;  %v3121_v60 = vld [vmem:[%s5986_s2 + $0xa8] sm:$0xf0]  ;;  %v3192_v62 = vor.u32 %v4202_v51, %v3191_v50  ;;  %v3268_v6 = vor.u32 %v4219_v56, %v3265_v57 }
  0x1e   :  { %568 = vmatpush.bf16.msra.mxu3 %v3232_v31  ;;  %v4215_v0 = vld [vmem:[%s5986_s2 + $0x214] sm:$0xf]  ;;  %v3249_v1 = vld [vmem:[%s5986_s2 + $0x228] sm:$0xf0]  ;;  %v3320_v2 = vor.u32 %v4234_v55, %v3319_v54  ;;  %v3175_v3 = vld [vmem:[%s5986_s2 + $0x128] sm:$0xf]  ;;  %v3124_v9 = vor.u32 %v4183_v59, %v3121_v60 }
  0x1f   :  { %v4198_v4 = vld [vmem:[%s5986_s2 + $0x13c] sm:$0xf0]  ;;  %v3303_v5 = vld [vmem:[%s5986_s2 + $0x2a8] sm:$0xf]  ;;  %v4179_v10 = vld [vmem:[%s5986_s2 + $0x64] sm:$0xf]  ;;  %v3252_v14 = vor.u32 %v4215_v0, %v3249_v1 }
  0x20   :  { %135 = vmatpush.bf16.msra.mxu0 %v3008_v15  ;;  %v4230_v7 = vld [vmem:[%s5986_s2 + $0x2bc] sm:$0xf0]  ;;  %v3176_v8 = vor.u32 %v4198_v4, %v3175_v3  ;;  %v3159_v12 = vld [vmem:[%s5986_s2 + $0xf8] sm:$0xf]  ;;  %v4194_v13 = vld [vmem:[%s5986_s2 + $0x10c] sm:$0xf0] }
  0x21   :  { %148 = vmatpush.bf16.msra.mxu1 %v3012_v20  ;;  %556 = vmatpush.bf16.msra.mxu2 %v3088_v42  ;;  %v3304_v11 = vor.u32 %v4230_v7, %v3303_v5  ;;  %v3105_v15 = vld [vmem:[%s5986_s2 + $0x78] sm:$0xf0]  ;;  %v3287_v16 = vld [vmem:[%s5986_s2 + $0x278] sm:$0xf]  ;;  %v4226_v17 = vld [vmem:[%s5986_s2 + $0x28c] sm:$0xf0]  ;;  %v3160_v20 = vor.u32 %v4194_v13, %v3159_v12 }
  0x22   :  { %569 = vmatpush.bf16.msra.mxu3 %v3216_v44  ;;  %v4211_v18 = vld [vmem:[%s5986_s2 + $0x1e4] sm:$0xf]  ;;  %v3233_v19 = vld [vmem:[%s5986_s2 + $0x1f8] sm:$0xf0]  ;;  %v3288_v22 = vor.u32 %v4226_v17, %v3287_v16  ;;  %v3089_v25 = vld [vmem:[%s5986_s2 + $0x48] sm:$0xf0] }
  0x23   :  { %136 = vmatmul.bf16.vlgmr.msra.gmra.mxu0 %v25_v27  ;;  %v3236_v23 = vor.u32 %v4211_v18, %v3233_v19  ;;  %v4207_v26 = vld [vmem:[%s5986_s2 + $0x1b4] sm:$0xf]  ;;  %v4171_v30 = vld [vmem:[%s5986_s2 + $0x4] sm:$0xf]  ;;  %v3073_v31 = vld [vmem:[%s5986_s2 + $0x18] sm:$0xf0] }
  0x24   :  { %576 = vmatpush.bf16.msrb.mxu0 %v3188_v21  ;;  %149 = vmatmul.bf16.vlgmr.msra.gmra.mxu1 %v25_v27  ;;  %v3108_v21 = vor.u32 %v4179_v10, %v3105_v15  ;;  %v3217_v27 = vld [vmem:[%s5986_s2 + $0x1c8] sm:$0xf0]  ;;  %v4203_v32 = vld [vmem:[%s5986_s2 + $0x184] sm:$0xf]  ;;  %v3201_v33 = vld [vmem:[%s5986_s2 + $0x198] sm:$0xf0]  ;;  %v3076_v38 = vor.u32 %v4171_v30, %v3073_v31 }
  0x25   :  { %589 = vmatpush.bf16.msrb.mxu1 %v3316_v24  ;;  %557 = vmatpush.bf16.msra.mxu2 %v3072_v58  ;;  %v4175_v24 = vld [vmem:[%s5986_s2 + $0x34] sm:$0xf]  ;;  %v3220_v29 = vor.u32 %v4207_v26, %v3217_v27  ;;  %v4232_v36 = vld [vmem:[%s5986_s2 + $0x2dc] sm:$0xf]  ;;  %v3204_v39 = vor.u32 %v4203_v32, %v3201_v33  ;;  %v4196_v42 = vld [vmem:[%s5986_s2 + $0x12c] sm:$0xf] }
  0x26   :  { %570 = vmatpush.bf16.msra.mxu3 %v3200_v61  ;;  %v3092_v28 = vor.u32 %v4175_v24, %v3089_v25  ;;  %v3193_v35 = vld [vmem:[%s5986_s2 + $0x170] sm:$0xf0]  ;;  %v3177_v43 = vld [vmem:[%s5986_s2 + $0x140] sm:$0xf0]  ;;  %v4228_v44 = vld [vmem:[%s5986_s2 + $0x2ac] sm:$0xf] }
  0x27   :  { %v3305_v45 = vld [vmem:[%s5986_s2 + $0x2c0] sm:$0xf0]  ;;  %v3180_v46 = vor.u32 %v4196_v42, %v3177_v43  ;;  %v3161_v49 = vld [vmem:[%s5986_s2 + $0x110] sm:$0xf0]  ;;  %v4224_v50 = vld [vmem:[%s5986_s2 + $0x27c] sm:$0xf] }
  0x28   :  { %577 = vmatpush.bf16.msrb.mxu0 %v3172_v34  ;;  %v4200_v34 = vld [vmem:[%s5986_s2 + $0x15c] sm:$0xf]  ;;  %v3308_v47 = vor.u32 %v4228_v44, %v3305_v45  ;;  %v3289_v51 = vld [vmem:[%s5986_s2 + $0x290] sm:$0xf0]  ;;  %v3143_v54 = vld [vmem:[%s5986_s2 + $0xc8] sm:$0xf] }
  0x29   :  { %590 = vmatpush.bf16.msrb.mxu1 %v3300_v37  ;;  %602 = vmatpush.bf16.msrb.mxu2 %v3192_v62  ;;  %v3321_v37 = vld [vmem:[%s5986_s2 + $0x2f0] sm:$0xf0]  ;;  %v3196_v40 = vor.u32 %v4200_v34, %v3193_v35  ;;  %v3292_v53 = vor.u32 %v4224_v50, %v3289_v51  ;;  %v4190_v55 = vld [vmem:[%s5986_s2 + $0xdc] sm:$0xf0]  ;;  %v3271_v57 = vld [vmem:[%s5986_s2 + $0x248] sm:$0xf] }
  0x2a   :  { %615 = vmatpush.bf16.msrb.mxu3 %v3320_v2  ;;  %v3324_v41 = vor.u32 %v4232_v36, %v3321_v37  ;;  %v3144_v56 = vor.u32 %v4190_v55, %v3143_v54  ;;  %v4222_v58 = vld [vmem:[%s5986_s2 + $0x25c] sm:$0xf0]  ;;  %v4188_v59 = vld [vmem:[%s5986_s2 + $0xcc] sm:$0xf]  ;;  %v3145_v61 = vld [vmem:[%s5986_s2 + $0xe0] sm:$0xf0] }
  0x2b   :  { %v3272_v60 = vor.u32 %v4222_v58, %v3271_v57  ;;  %v4220_v62 = vld [vmem:[%s5986_s2 + $0x24c] sm:$0xf]  ;;  %v3148_v0 = vor.u32 %v4188_v59, %v3145_v61  ;;  %v3127_v2 = vld [vmem:[%s5986_s2 + $0x98] sm:$0xf]  ;;  %v4186_v3 = vld [vmem:[%s5986_s2 + $0xac] sm:$0xf0] }
  0x2c   :  { %578 = vmatpush.bf16.msrb.mxu0 %v3156_v48  ;;  %v4192_v48 = vld [vmem:[%s5986_s2 + $0xfc] sm:$0xf]  ;;  %v3255_v4 = vld [vmem:[%s5986_s2 + $0x218] sm:$0xf]  ;;  %v3128_v5 = vor.u32 %v4186_v3, %v3127_v2  ;;  %v3257_v12 = vld [vmem:[%s5986_s2 + $0x230] sm:$0xf0] }
  0x2d   :  { %591 = vmatpush.bf16.msrb.mxu1 %v3284_v52  ;;  %603 = vmatpush.bf16.msrb.mxu2 %v3176_v8  ;;  %v3164_v52 = vor.u32 %v4192_v48, %v3161_v49  ;;  %v4184_v7 = vld [vmem:[%s5986_s2 + $0x9c] sm:$0xf]  ;;  %v3129_v8 = vld [vmem:[%s5986_s2 + $0xb0] sm:$0xf0]  ;;  %v4182_v15 = vld [vmem:[%s5986_s2 + $0x7c] sm:$0xf0] }
  0x2e   :  { %616 = vmatpush.bf16.msrb.mxu3 %v3304_v11  ;;  %v3132_v10 = vor.u32 %v4184_v7, %v3129_v8  ;;  %v4216_v11 = vld [vmem:[%s5986_s2 + $0x21c] sm:$0xf]  ;;  %v3239_v16 = vld [vmem:[%s5986_s2 + $0x1e8] sm:$0xf]  ;;  %v4214_v18 = vld [vmem:[%s5986_s2 + $0x1fc] sm:$0xf0] }
  0x2f   :  { %v3260_v13 = vor.u32 %v4216_v11, %v3257_v12  ;;  %v4180_v19 = vld [vmem:[%s5986_s2 + $0x6c] sm:$0xf]  ;;  %v3241_v24 = vld [vmem:[%s5986_s2 + $0x200] sm:$0xf0]  ;;  %v3095_v25 = vld [vmem:[%s5986_s2 + $0x38] sm:$0xf] }
  0x30   :  { %579 = vmatpush.bf16.msrb.mxu0 %v3140_v63  ;;  %v3273_v63 = vld [vmem:[%s5986_s2 + $0x260] sm:$0xf0]  ;;  %v4178_v27 = vld [vmem:[%s5986_s2 + $0x4c] sm:$0xf0]  ;;  %v4176_v32 = vld [vmem:[%s5986_s2 + $0x3c] sm:$0xf] }
  0x31   :  { %592 = vmatpush.bf16.msrb.mxu1 %v3268_v6  ;;  %604 = vmatpush.bf16.msrb.mxu2 %v3160_v20  ;;  %v3276_v1 = vor.u32 %v4220_v62, %v3273_v63  ;;  %v4218_v6 = vld [vmem:[%s5986_s2 + $0x22c] sm:$0xf0]  ;;  %v3113_v20 = vld [vmem:[%s5986_s2 + $0x80] sm:$0xf0]  ;;  %v3096_v30 = vor.u32 %v4178_v27, %v3095_v25  ;;  %v3097_v33 = vld [vmem:[%s5986_s2 + $0x50] sm:$0xf0] }
  0x32   :  { %617 = vmatpush.bf16.msrb.mxu3 %v3288_v22  ;;  %v3116_v22 = vor.u32 %v4180_v19, %v3113_v20  ;;  %v4208_v34 = vld [vmem:[%s5986_s2 + $0x1bc] sm:$0xf]  ;;  %v3100_v35 = vor.u32 %v4176_v32, %v3097_v33  ;;  %v3225_v36 = vld [vmem:[%s5986_s2 + $0x1d0] sm:$0xf0]  ;;  %v3079_v37 = vld [vmem:[%s5986_s2 + $0x8] sm:$0xf] }
  0x33   :  { %v4172_v42 = vld [vmem:[%s5986_s2 + $0xc] sm:$0xf]  ;;  %v3081_v44 = vld [vmem:[%s5986_s2 + $0x20] sm:$0xf0]  ;;  %v42_v50 = vld [vmem:[%s5988_s5] sm:$0x3] }
  0x34   :  { %580 = vmatpush.bf16.msrb.mxu0 %v3124_v9  ;;  %v3256_v9 = vor.u32 %v4218_v6, %v3255_v4  ;;  %v4204_v45 = vld [vmem:[%s5986_s2 + $0x18c] sm:$0xf]  ;;  %v3084_v48 = vor.u32 %v4172_v42, %v3081_v44  ;;  %v44_v51 = vperm.slane %v42_v50, 0  ;;  %v3335_v54 = vld [vmem:[%s5989_s3 + $0xf0] sm:$0xf] }
  0x35   :  { %593 = vmatpush.bf16.msrb.mxu1 %v3252_v14  ;;  %605 = vmatpush.bf16.msrb.mxu2 %v3144_v56  ;;  %v3111_v14 = vld [vmem:[%s5986_s2 + $0x68] sm:$0xf]  ;;  %v4237_v58 = vld [vmem:[%s5989_s3 + $0xf4] sm:$0xf]  ;;  %v3337_v59 = vld [vmem:[%s5989_s3 + $0x148] sm:$0xf0] }
  0x36   :  { %618 = vmatpush.bf16.msrb.mxu3 %v3272_v60  ;;  %v3112_v17 = vor.u32 %v4182_v15, %v3111_v14  ;;  %v4238_v55 = vld [vmem:[%s5989_s3 + $0x144] sm:$0xf0]  ;;  %v4236_v2 = vld [vmem:[%s5989_s3 + $0x94] sm:$0xf0]  ;;  %v4235_v3 = vld [vmem:[%s5989_s3 + $0x44] sm:$0xf] }
  0x37   :  { %v3336_v62 = vor.u32 %v4238_v55, %v3335_v54  ;;  %v3329_v4 = vld [vmem:[%s5989_s3 + $0x98] sm:$0xf0]  ;;  %v4246_v11 = vld [vmem:[%s5986_s2 + $0x174] sm:$0xf0]  ;;  %v3405_v12 = vld [vmem:[%s5986_s2 + $0x2e0] sm:$0xf] }
  0x38   :  { %581 = vmatpush.bf16.msrb.mxu0 %v3108_v21  ;;  %v3240_v21 = vor.u32 %v4214_v18, %v3239_v16  ;;  %v3332_v7 = vor.u32 %v4235_v3, %v3329_v4  ;;  %v4254_v15 = vld [vmem:[%s5986_s2 + $0x2f4] sm:$0xf0]  ;;  %v3369_v16 = vld [vmem:[%s5986_s2 + $0x130] sm:$0xf]  ;;  %v4253_v20 = vld [vmem:[%s5986_s2 + $0x2c4] sm:$0xf0] }
  0x39   :  { %594 = vmatpush.bf16.msrb.mxu1 %v3236_v23  ;;  %606 = vmatpush.bf16.msrb.mxu2 %v3128_v5  ;;  %v4212_v23 = vld [vmem:[%s5986_s2 + $0x1ec] sm:$0xf]  ;;  %v3406_v18 = vor.u32 %v4254_v15, %v3405_v12  ;;  %v3401_v19 = vld [vmem:[%s5986_s2 + $0x2b0] sm:$0xf]  ;;  %v4244_v27 = vld [vmem:[%s5986_s2 + $0x114] sm:$0xf0] }
  0x3a   :  { %619 = vmatpush.bf16.msrb.mxu3 %v3256_v9  ;;  %v3244_v26 = vor.u32 %v4212_v23, %v3241_v24  ;;  %v3402_v25 = vor.u32 %v4253_v20, %v3401_v19  ;;  %v3357_v44 = vld [vmem:[%s5986_s2 + $0xa0] sm:$0xf]  ;;  %v4241_v54 = vld [vmem:[%s5986_s2 + $0x84] sm:$0xf0] }
  0x3b   :  { %v4247_v20 = vld [vmem:[%s5986_s2 + $0x1a4] sm:$0xf0] }
  0x3c   :  { %582 = vmatpush.bf16.msrb.mxu0 %v3092_v28  ;;  %v3223_v28 = vld [vmem:[%s5986_s2 + $0x1b8] sm:$0xf] }
  0x3d   :  { %595 = vmatpush.bf16.msrb.mxu1 %v3220_v29  ;;  %607 = vmatpush.bf16.msrb.mxu2 %v3112_v17  ;;  %v4210_v29 = vld [vmem:[%s5986_s2 + $0x1cc] sm:$0xf0]  ;;  %v4245_v17 = vld [vmem:[%s5986_s2 + $0x144] sm:$0xf0] }
  0x3e   :  { %620 = vmatpush.bf16.msrb.mxu3 %v3240_v21  ;;  %v3224_v31 = vor.u32 %v4210_v29, %v3223_v28  ;;  %v5041_v21 = vld [vmem:[%s5988_s5 + $0x2] sm:$0xf]  ;;  %v3370_v23 = vor.u32 %v4245_v17, %v3369_v16  ;;  %v4252_v29 = vld [vmem:[%s5986_s2 + $0x294] sm:$0xf0]  ;;  %v3345_v16 = vld [vmem:[%s5986_s2 + $0x10] sm:$0xf] }
  0x3f   :  { %v222_v24 = vperm.slane %v5041_v21, 0  ;;  %v3397_v28 = vld [vmem:[%s5986_s2 + $0x280] sm:$0xf]  ;;  %v4239_v17 = vld [vmem:[%s5986_s2 + $0x24] sm:$0xf0] }
  0x40   :  { %583 = vmatpush.bf16.msrb.mxu0 %v3076_v38  ;;  %v4174_v38 = vld [vmem:[%s5986_s2 + $0x1c] sm:$0xf0]  ;;  %v3346_v19 = vor.u32 %v4239_v17, %v3345_v16  ;;  %v3484_v16 = vld [vmem:[%s5986_s2 + $0x2b4] sm:$0xf]  ;;  %v4273_v17 = vld [vmem:[%s5986_s2 + $0x2c8] sm:$0xf0] }
  0x41   :  { %596 = vmatpush.bf16.msrb.mxu1 %v3204_v39  ;;  %v3228_v39 = vor.u32 %v4208_v34, %v3225_v36  ;;  %608 = vmatpush.bf16.msrb.mxu2 %v3096_v30  ;;  %v3080_v43 = vor.u32 %v4174_v38, %v3079_v37  ;;  %v3398_v34 = vor.u32 %v4252_v29, %v3397_v28  ;;  %v4243_v36 = vld [vmem:[%s5986_s2 + $0xe4] sm:$0xf0]  ;;  %v3393_v38 = vld [vmem:[%s5986_s2 + $0x250] sm:$0xf] }
  0x42   :  { %621 = vmatpush.bf16.msrb.mxu3 %v3224_v31 }
  0x44   :  { %628 = vmatpush.bf16.msra.mxu0 %v3196_v40  ;;  %v3207_v40 = vld [vmem:[%s5986_s2 + $0x188] sm:$0xf] }
  0x45   :  { %641 = vmatpush.bf16.msra.mxu1 %v3324_v41  ;;  %v4206_v41 = vld [vmem:[%s5986_s2 + $0x19c] sm:$0xf0]  ;;  %609 = vmatpush.bf16.msrb.mxu2 %v3080_v43 }
  0x48   :  { %629 = vmatpush.bf16.msra.mxu0 %v3180_v46  ;;  %v3209_v46 = vld [vmem:[%s5986_s2 + $0x1a0] sm:$0xf0] }
  0x49   :  { %642 = vmatpush.bf16.msra.mxu1 %v3308_v47  ;;  %v3208_v47 = vor.u32 %v4206_v41, %v3207_v40  ;;  %v3212_v49 = vor.u32 %v4204_v45, %v3209_v46  ;;  %v4242_v45 = vld [vmem:[%s5986_s2 + $0xb4] sm:$0xf0]  ;;  %v3389_v46 = vld [vmem:[%s5986_s2 + $0x220] sm:$0xf] }
  0x4b   :  { %622 = vmatpush.bf16.msrb.mxu3 %v3208_v47  ;;  %v4250_v47 = vld [vmem:[%s5986_s2 + $0x234] sm:$0xf0] }
  0x4c   :  { %630 = vmatpush.bf16.msra.mxu0 %v3164_v52  ;;  %v45_v52 = vperm.slane %v42_v50, 1  ;;  %v3358_v50 = vor.u32 %v4242_v45, %v3357_v44 }
  0x4d   :  { %643 = vmatpush.bf16.msra.mxu1 %v3292_v53 }
  0x50   :  { %631 = vmatpush.bf16.msra.mxu0 %v3148_v0  ;;  %v3340_v0 = vor.u32 %v4237_v58, %v3337_v59 }
  0x51   :  { %644 = vmatpush.bf16.msra.mxu1 %v3276_v1  ;;  %v3327_v1 = vld [vmem:[%s5989_s3 + $0x40] sm:$0xf] }
  0x52   :  { %v3328_v5 = vor.u32 %v4236_v2, %v3327_v1 }
  0x54   :  { %632 = vmatpush.bf16.msra.mxu0 %v3132_v10  ;;  %v3373_v10 = vld [vmem:[%s5986_s2 + $0x160] sm:$0xf] }
  0x55   :  { %645 = vmatpush.bf16.msra.mxu1 %v3260_v13  ;;  %v3374_v14 = vor.u32 %v4246_v11, %v3373_v10  ;;  %v4240_v10 = vld [vmem:[%s5986_s2 + $0x54] sm:$0xf0]  ;;  %v3381_v11 = vld [vmem:[%s5986_s2 + $0x1c0] sm:$0xf] }
  0x58   :  { %633 = vmatpush.bf16.msra.mxu0 %v3116_v22 }
  0x59   :  { %646 = vmatpush.bf16.msra.mxu1 %v3244_v26  ;;  %v3365_v26 = vld [vmem:[%s5986_s2 + $0x100] sm:$0xf] }
  0x5a   :  { %v3366_v31 = vor.u32 %v4244_v27, %v3365_v26 }
  0x5c   :  { %634 = vmatpush.bf16.msra.mxu0 %v3100_v35  ;;  %v3361_v35 = vld [vmem:[%s5986_s2 + $0xd0] sm:$0xf] }
  0x5d   :  { %647 = vmatpush.bf16.msra.mxu1 %v3228_v39  ;;  %v4251_v39 = vld [vmem:[%s5986_s2 + $0x264] sm:$0xf0]  ;;  %v3362_v42 = vor.u32 %v4243_v36, %v3361_v35 }
  0x5e   :  { %v3394_v43 = vor.u32 %v4251_v39, %v3393_v38 }
  0x60   :  { %635 = vmatpush.bf16.msra.mxu0 %v3084_v48  ;;  %v225_v48 = vperm.slane %v5041_v21, 3 }
  0x61   :  { %648 = vmatpush.bf16.msra.mxu1 %v3212_v49 }
  0xa0   :  { %v137_v53 = vpop.f32.mrf.mxu0 }
  0xa1   :  { %v138_v56 = vadd.f32 %v137_v53, %v44_v51  ;;  %v150_v57 = vpop.f32.mrf.mxu1  ;;  %v3353_v53 = vld [vmem:[%s5986_s2 + $0x70] sm:$0xf] }
  0xa2   :  { %v4993_v60 = vadd.f32 %v150_v57, %v45_v52  ;;  %v3390_v52 = vor.u32 %v4250_v47, %v3389_v46  ;;  %v4249_v57 = vld [vmem:[%s5986_s2 + $0x204] sm:$0xf0]  ;;  %v884_v46 = vld [vmem:[%s5989_s3 + $0x104] sm:$0xf]  ;;  %v883_v47 = vld [vmem:[%s5989_s3 + $0xac] sm:$0xf] }
  0xa3   :  { %v154_v61 = vpack.c.bf16 %v138_v56, %v138_v56  ;;  %v3385_v56 = vld [vmem:[%s5986_s2 + $0x1f0] sm:$0xf] }
  0xa4   :  { %v155_v63 = vpack.c.bf16 %v4993_v60, %v4993_v60 }
  0xa5   :  { %558 = vmatmul.bf16.vlgmr.msra.gmra.mxu2 %v154_v61  ;;  %584 = vmatmul.bf16.vlgmr.msrb.gmra.mxu0 %v154_v61 }
  0xa6   :  { %665 = vrot.lane.b32.xlu0 %v155_v63, %s4457_s7  ;;  %571 = vmatmul.bf16.vlgmr.msra.gmra.mxu3 %v155_v63 }
  0xa7   :  { %597 = vmatmul.bf16.vlgmr.msrb.gmra.mxu1 %v155_v63  ;;  %697 = vmatpush.bf16.msra.mxu2 %v3336_v62 }
  0xa8   :  { %v139_v6 = vpop.f32.mrf.mxu0  ;;  %710 = vmatpush.bf16.msra.mxu3 %v3340_v0  ;;  %v3386_v0 = vor.u32 %v4249_v57, %v3385_v56  ;;  %v3418_v56 = vld [vmem:[%s5989_s3 + $0xf8] sm:$0xf]  ;;  %v4258_v57 = vld [vmem:[%s5989_s3 + $0x14c] sm:$0xf0] }
  0xa9   :  { %v152_v8 = vpop.f32.mrf.mxu1 }
  0xab   :  { %698 = vmatpush.bf16.msra.mxu2 %v3328_v5 }
  0xac   :  { %711 = vmatpush.bf16.msra.mxu3 %v3332_v7 }
  0xb5   :  { %610 = vmatmul.bf16.vlgmr.msrb.gmra.mxu2 %v154_v61  ;;  %636 = vmatmul.bf16.vlgmr.msra.gmra.mxu0 %v154_v61  ;;  %v3354_v61 = vor.u32 %v4241_v54, %v3353_v53 }
  0xb6   :  { %623 = vmatmul.bf16.vlgmr.msrb.gmra.mxu3 %v155_v63  ;;  %849 = vmatpush.bf16.msrb.mxu2 %v3374_v14  ;;  %v4248_v14 = vld [vmem:[%s5986_s2 + $0x1d4] sm:$0xf0] }
  0xb7   :  { %649 = vmatmul.bf16.vlgmr.msra.gmra.mxu1 %v155_v63  ;;  %862 = vmatpush.bf16.msrb.mxu3 %v3406_v18  ;;  %v224_v63 = vperm.slane %v5041_v21, 2  ;;  %v3382_v15 = vor.u32 %v4248_v14, %v3381_v11  ;;  %v3377_v18 = vld [vmem:[%s5986_s2 + $0x190] sm:$0xf]  ;;  %v4274_v11 = vld [vmem:[%s5986_s2 + $0x2f8] sm:$0xf0] }
  0xb8   :  { %v4265_v14 = vld [vmem:[%s5986_s2 + $0x148] sm:$0xf0] }
  0xba   :  { %850 = vmatpush.bf16.msrb.mxu2 %v3370_v23  ;;  %v3378_v23 = vor.u32 %v4247_v20, %v3377_v18  ;;  %v3448_v20 = vld [vmem:[%s5986_s2 + $0x104] sm:$0xf] }
  0xbb   :  { %863 = vmatpush.bf16.msrb.mxu3 %v3402_v25  ;;  %v658_v25 = vld [vmem:[%s5988_s5 + $0x6] sm:$0x3] }
  0xbc   :  { %v660_v27 = vperm.slane %v658_v25, 0  ;;  %v661_v28 = vperm.slane %v658_v25, 1  ;;  %v4272_v25 = vld [vmem:[%s5986_s2 + $0x298] sm:$0xf0] }
  0xbe   :  { %851 = vmatpush.bf16.msrb.mxu2 %v3366_v31 }
  0xbf   :  { %864 = vmatpush.bf16.msrb.mxu3 %v3398_v34 }
  0xc2   :  { %852 = vmatpush.bf16.msrb.mxu2 %v3362_v42 }
  0xc3   :  { %865 = vmatpush.bf16.msrb.mxu3 %v3394_v43 }
  0xc6   :  { %853 = vmatpush.bf16.msrb.mxu2 %v3358_v50  ;;  %v887_v50 = vunpack.c.l.bf16 %v883_v47  ;;  %v3432_v47 = vld [vmem:[%s5986_s2 + $0x44] sm:$0xf] }
  0xc7   :  { %866 = vmatpush.bf16.msrb.mxu3 %v3390_v52 }
  0xca   :  { %854 = vmatpush.bf16.msrb.mxu2 %v3354_v61  ;;  %v3420_v61 = vld [vmem:[%s5989_s3 + $0x150] sm:$0xf0] }
  0xcb   :  { %867 = vmatpush.bf16.msrb.mxu3 %v3386_v0  ;;  %v3410_v0 = vld [vmem:[%s5989_s3 + $0x48] sm:$0xf] }
  0xcf   :  { %868 = vmatpush.bf16.msrb.mxu3 %v3382_v15 }
  0xd3   :  { %869 = vmatpush.bf16.msrb.mxu3 %v3378_v23  ;;  %v4264_v23 = vld [vmem:[%s5986_s2 + $0x118] sm:$0xf0] }
 0x118   :  { %v666_v9 = vpop.permute.xlu0 %665 }
 0x119   :  { %3341 = vmatmul.msk.bf16.vlgmr.msra.gmra.mxu2 %vm687_vm0, %v666_v9  ;;  %3342 = vmatmul.msk.bf16.vlgmr.msra.gmra.mxu3 %vm687_vm0, %v666_v9  ;;  %v3349_v9 = vld [vmem:[%s5986_s2 + $0x40] sm:$0xf] }
 0x11a   :  { %v3350_v12 = vor.u32 %v4240_v10, %v3349_v9  ;;  %v3488_v9 = vld [vmem:[%s5986_s2 + $0x2e4] sm:$0xf] }
 0x11b   :  { %v3489_v15 = vor.u32 %v4274_v11, %v3488_v9 }
 0x11c   :  { %855 = vmatpush.bf16.msrb.mxu2 %v3350_v12  ;;  %v3452_v12 = vld [vmem:[%s5986_s2 + $0x134] sm:$0xf] }
 0x11d   :  { %v3453_v18 = vor.u32 %v4265_v14, %v3452_v12 }
 0x120   :  { %856 = vmatpush.bf16.msrb.mxu2 %v3346_v19  ;;  %v3485_v19 = vor.u32 %v4273_v17, %v3484_v16  ;;  %v4440_v17 = vld [vmem:[%s5988_s5 + $0x19] ss:$0 sm:$0xff] }
 0x122   :  { %v5021_v13 = vpop.f32.mrf.mxu0 }
 0x124   :  { %v5043_v22 = vpop.f32.mrf.mxu1  ;;  %1131 = vmatpush.bf16.msra.mxu2 %v3489_v15 }
 0x128   :  { %v559_v30 = vpop.f32.mrf.mxu2  ;;  %1132 = vmatpush.bf16.msra.mxu2 %v3485_v19 }
 0x129   :  { %v560_v32 = vadd.f32 %v559_v30, %v222_v24  ;;  %v572_v33 = vpop.f32.mrf.mxu3  ;;  %v223_v24 = vperm.slane %v5041_v21, 1 }
 0x12a   :  { %v587_v37 = vpop.f32.mrf.mxu0 }
 0x12b   :  { %v5070_v40 = vadd.f32 %v572_v33, %v560_v32  ;;  %v586_v26 = vadd.f32 %v5021_v13, %v223_v24  ;;  %v3480_v24 = vld [vmem:[%s5986_s2 + $0x284] sm:$0xf] }
 0x12c   :  { %v600_v41 = vpop.f32.mrf.mxu1 }
 0x12d   :  { %v599_v31 = vadd.f32 %v5043_v22, %v586_v26  ;;  %v3449_v26 = vor.u32 %v4264_v23, %v3448_v20 }
 0x130   :  { %v561_v49 = vpop.f32.mrf.mxu2 }
 0x131   :  { %v574_v51 = vpop.f32.mrf.mxu3  ;;  %v888_v49 = vunpack.c.l.bf16 %v884_v46 }
 0x132   :  { %v637_v55 = vpop.f32.mrf.mxu0 }
 0x133   :  { %v638_v58 = vadd.f32 %v637_v55, %v225_v48  ;;  %v882_v48 = vld [vmem:[%s5989_s3 + $0x54] sm:$0xf] }
 0x134   :  { %v650_v59 = vpop.f32.mrf.mxu1  ;;  %v886_v51 = vunpack.c.l.bf16 %v882_v48  ;;  %v4260_v48 = vld [vmem:[%s5986_s2 + $0x58] sm:$0xf0] }
 0x135   :  { %v5097_v62 = vadd.f32 %v650_v59, %v638_v58  ;;  %v4257_v58 = vld [vmem:[%s5989_s3 + $0xfc] sm:$0xf]  ;;  %v3419_v59 = vor.u32 %v4258_v57, %v3418_v56 }
 0x137   :  { %962 = vmatpush.bf16.msrb.mxu1 %v3419_v59 }
 0x138   :  { %v611_v1 = vpop.f32.mrf.mxu2 }
 0x139   :  { %v612_v2 = vadd.f32 %v611_v1, %v224_v63  ;;  %v624_v3 = vpop.f32.mrf.mxu3  ;;  %v3423_v63 = vor.u32 %v4257_v58, %v3420_v61  ;;  %v4256_v1 = vld [vmem:[%s5989_s3 + $0x9c] sm:$0xf0] }
 0x13a   :  { %v639_v4 = vpop.f32.mrf.mxu0 }
 0x13b   :  { %v5100_v5 = vadd.f32 %v624_v3, %v612_v2  ;;  %v4255_v2 = vld [vmem:[%s5989_s3 + $0x4c] sm:$0xf]  ;;  %v3411_v3 = vor.u32 %v4256_v1, %v3410_v0  ;;  %v3412_v4 = vld [vmem:[%s5989_s3 + $0xa0] sm:$0xf0]  ;;  %v3428_v1 = vld [vmem:[%s5986_s2 + $0x14] sm:$0xf] }
 0x13c   :  { %v652_v6 = vpop.f32.mrf.mxu1 }
 0x13d   :  { %v3415_v6 = vor.u32 %v4255_v2, %v3412_v4  ;;  %963 = vmatpush.bf16.msrb.mxu1 %v3411_v3  ;;  %v4259_v2 = vld [vmem:[%s5986_s2 + $0x28] sm:$0xf0]  ;;  %v3460_v3 = vld [vmem:[%s5986_s2 + $0x194] sm:$0xf] }
 0x13e   :  { %v3429_v4 = vor.u32 %v4259_v2, %v3428_v1  ;;  %v4277_v1 = vld [vmem:[%s5989_s3 + $0x14] sm:$0xf]  ;;  %v3510_v2 = vld [vmem:[%s5989_s3 + $0x68] sm:$0xf0] }
 0x140   :  { %v613_v7 = vpop.f32.mrf.mxu2 }
 0x141   :  { %v626_v8 = vpop.f32.mrf.mxu3  ;;  %v3456_v7 = vld [vmem:[%s5986_s2 + $0x164] sm:$0xf] }
 0x142   :  { %v4266_v8 = vld [vmem:[%s5986_s2 + $0x178] sm:$0xf0] }
 0x143   :  { %v3457_v10 = vor.u32 %v4266_v8, %v3456_v7 }
 0x145   :  { %1118 = vmatpush.bf16.msra.mxu1 %v3457_v10 }
 0x149   :  { %1119 = vmatpush.bf16.msra.mxu1 %v3453_v18 }
 0x14d   :  { %1120 = vmatpush.bf16.msra.mxu1 %v3449_v26 }
 0x19c   :  { %v700_v29 = vpop.f32.mrf.mxu2  ;;  %v713_v30 = vpop.f32.mrf.mxu3 }
 0x19d   :  { %v701_v32 = vadd.f32 %v700_v29, %v660_v27  ;;  %v714_v33 = vadd.f32 %v713_v30, %v661_v28  ;;  %v3481_v27 = vor.u32 %v4272_v25, %v3480_v24  ;;  %v3444_v28 = vld [vmem:[%s5986_s2 + $0xd4] sm:$0xf]  ;;  %v4263_v29 = vld [vmem:[%s5986_s2 + $0xe8] sm:$0xf0] }
 0x19e   :  { %v3476_v30 = vld [vmem:[%s5986_s2 + $0x254] sm:$0xf] }
 0x19f   :  { %v717_v34 = vmul.f32 %v701_v32, %v5070_v40  ;;  %v718_v35 = vmul.f32 %v714_v33, %v599_v31  ;;  %v885_v40 = vld [vmem:[%s5989_s3 + $0x15c] sm:$0xf]  ;;  %v4271_v31 = vld [vmem:[%s5986_s2 + $0x268] sm:$0xf0]  ;;  %v3445_v33 = vor.u32 %v4263_v29, %v3444_v28  ;;  %1133 = vmatpush.bf16.msra.mxu2 %v3481_v27  ;;  %v4459_v27 = vmov 32.0  }
 0x1a0   :  { %v889_v45 = vunpack.c.l.bf16 %v885_v40 }
 0x1a1   :  { %v719_v36 = vpack.c.bf16 %v717_v34, %v717_v34  ;;  %v720_v37 = vpack.c.bf16 %v718_v35, %v718_v35  ;;  %v3477_v34 = vor.u32 %v4271_v31, %v3476_v30  ;;  %v3440_v35 = vld [vmem:[%s5986_s2 + $0xa4] sm:$0xf]  ;;  %1121 = vmatpush.bf16.msra.mxu1 %v3445_v33 }
 0x1a2   :  { %905 = vmatpush.msrb.mxu0 %v889_v45 }
 0x1a3   :  { %857 = vmatmul.bf16.vlgmr.msrb.gmra.mxu2 %v719_v36  ;;  %870 = vmatmul.bf16.vlgmr.msrb.gmra.mxu3 %v720_v37  ;;  %v4262_v36 = vld [vmem:[%s5986_s2 + $0xb8] sm:$0xf0]  ;;  %v3472_v37 = vld [vmem:[%s5986_s2 + $0x224] sm:$0xf] }
 0x1a4   :  { %v702_v21 = vpop.f32.mrf.mxu2  ;;  %v715_v38 = vpop.f32.mrf.mxu3  ;;  %906 = vmatpush.msrb.mxu0 %v888_v49  ;;  %1134 = vmatpush.bf16.msra.mxu2 %v3477_v34 }
 0x1a5   :  { %v4270_v21 = vld [vmem:[%s5986_s2 + $0x238] sm:$0xf0]  ;;  %v3441_v38 = vor.u32 %v4262_v36, %v3440_v35 }
 0x1a6   :  { %907 = vmatpush.msrb.mxu0 %v887_v50  ;;  %v3464_v50 = vld [vmem:[%s5986_s2 + $0x1c4] sm:$0xf] }
 0x1a7   :  { %1122 = vmatpush.bf16.msra.mxu1 %v3441_v38 }
 0x1a8   :  { %908 = vmatpush.msrb.mxu0 %v886_v51  ;;  %v4268_v51 = vld [vmem:[%s5986_s2 + $0x1d8] sm:$0xf0] }
 0x1a9   :  { %v3465_v57 = vor.u32 %v4268_v51, %v3464_v50  ;;  %v3574_v50 = vld [vmem:[%s5989_s3 + $0x118] sm:$0xf0]  ;;  %v3492_v51 = vld [vmem:[%s5989_s3] sm:$0xf] }
 0x1aa   :  { %975 = vmatpush.bf16.msra.mxu0 %v3423_v63 }
 0x1ae   :  { %976 = vmatpush.bf16.msra.mxu0 %v3415_v6 }
 0x226   :  { %v858_v39 = vpop.f32.mrf.mxu2  ;;  %v871_v41 = vpop.f32.mrf.mxu3 }
 0x227   :  { %v872_v13 = vadd.f32 %v871_v41, %v858_v39  ;;  %v3473_v39 = vor.u32 %v4270_v21, %v3472_v37  ;;  %v3436_v41 = vld [vmem:[%s5986_s2 + $0x74] sm:$0xf]  ;;  %v4441_v37 = vld [vmem:[%s5988_s5 + $0x1a] ss:$0 sm:$0xff]  ;;  %v4442_v21 = vld [vmem:[%s5988_s5 + $0x1b] ss:$0 sm:$0xff] }
 0x229   :  { %v875_v42 = vmul.f32 0.35355338, %v872_v13  ;;  %v4261_v13 = vld [vmem:[%s5986_s2 + $0x88] sm:$0xf0]  ;;  %1135 = vmatpush.bf16.msra.mxu2 %v3473_v39 }
 0x22a   :  { %v3437_v40 = vor.u32 %v4261_v13, %v3436_v41  ;;  %v3556_v41 = vld [vmem:[%s5989_s3 + $0xb0] sm:$0xf]  ;;  %v4299_v13 = vld [vmem:[%s5989_s3 + $0x104] sm:$0xf0] }
 0x22b   :  { %v876_v43 = vsel %vm687_vm0, %v875_v42, -inf }
 0x22c   :  { %877 = vmax.xlane.f32.xlu0 %v876_v43  ;;  %v3468_v43 = vld [vmem:[%s5986_s2 + $0x1f4] sm:$0xf]  ;;  %1123 = vmatpush.bf16.msra.mxu1 %v3437_v40  ;;  %v3572_v40 = vld [vmem:[%s5989_s3 + $0xc0] sm:$0xf] }
 0x22e   :  { %v860_v44 = vpop.f32.mrf.mxu2  ;;  %v873_v22 = vpop.f32.mrf.mxu3 }
 0x22f   :  { %v4269_v44 = vld [vmem:[%s5986_s2 + $0x208] sm:$0xf0] }
 0x230   :  { %v3469_v46 = vor.u32 %v4269_v44, %v3468_v43  ;;  %v3557_v44 = vor.u32 %v4299_v13, %v3556_v41  ;;  %v3580_v13 = vld [vmem:[%s5989_s3 + $0xc8] sm:$0xf] }
 0x232   :  { %1136 = vmatpush.bf16.msra.mxu2 %v3469_v46  ;;  %1441 = vmatpush.bf16.msra.mxu3 %v3557_v44  ;;  %v3582_v44 = vld [vmem:[%s5989_s3 + $0x120] sm:$0xf0] }
 0x236   :  { %1137 = vmatpush.bf16.msra.mxu2 %v3465_v57 }
 0x29f   :  { %v878_v52 = vpop.xlane.xlu0 %877 }
 0x2a0   :  { %v879_v53 = vsub.f32 %v875_v42, %v878_v52 }
 0x2a2   :  { %v880_v54 = vmul.f32 1.442695, %v879_v53 }
 0x2a4   :  { %4447 = vpow2.f32 %v880_v54  ;;  %v3433_v54 = vor.u32 %v4260_v48, %v3432_v47 }
 0x2a6   :  { %1124 = vmatpush.bf16.msra.mxu1 %v3433_v54  ;;  %v4275_v54 = vld [vmem:[%s5989_s3 + $0x4] sm:$0xf] }
 0x2aa   :  { %v5146_v55 = vpop.eup %4447  ;;  %1125 = vmatpush.bf16.msra.mxu1 %v3429_v4 }
 0x2ab   :  { %3407 = vmatmul.msk.f32.vlgmr.msrb.gmra.mxu0 %vm687_vm0, %v5146_v55 }
 0x328   :  { %v910_v32 = vpop.f32.mrf.mxu0 }
 0x329   :  { %4449 = vrcp.f32 %v910_v32  ;;  %v924_v49 = vand.u32 2147483648, %v910_v32  ;;  %v922_v53 = vand.u32 2147483647, %v910_v32  ;;  %vm918_vm2 = vweird.f32 %v910_v32 }
 0x32a   :  { %4451 = vrcp.f32 %v4459_v27  ;;  %v4295_v27 = vld [vmem:[%s5989_s3 + $0xd4] sm:$0xf] }
 0x32b   :  { %v925_v58 = vor.u32 1.1754944e-38, %v924_v49  ;;  %vm923_vm4 = vcmp.eq.f32.partialorder %v922_v53, 8.507059e+37  ;;  %v4293_v49 = vld [vmem:[%s5989_s3 + $0xc4] sm:$0xf]  ;;  %v4283_v53 = vld [vmem:[%s5989_s3 + $0x54] sm:$0xf0] }
 0x32f   :  { %v4450_v42 = vpop.eup %4449 }
 0x330   :  { %v914_v22 = vmul.f32 %v4450_v42, %v910_v32  ;;  %vm919_vm1 = vweird.f32 %v4450_v42  ;;  %v4452_v28 = vpop.eup %4451 }
 0x331   :  { %vm920_vm3 = vmor %vm918_vm2, %vm919_vm1  ;;  %v1159_v29 = vmul.f32 32.0, %v4452_v28  ;;  %vm1163_vm5 = vweird.f32 %v4452_v28 }
 0x332   :  { %v915_v45 = vsub.f32 1.0, %v914_v22  ;;  %v3558_v22 = vld [vmem:[%s5989_s3 + $0x108] sm:$0xf0] }
 0x333   :  { %v1160_v30 = vsub.f32 1.0, %v1159_v29  ;;  %v3500_v29 = vld [vmem:[%s5989_s3 + $0x8] sm:$0xf] }
 0x334   :  { %v916_v52 = vmul.f32 %v4450_v42, %v915_v45  ;;  %v4301_v45 = vld [vmem:[%s5989_s3 + $0x114] sm:$0xf0] }
 0x335   :  { %v1161_v31 = vmul.f32 %v4452_v28, %v1160_v30  ;;  %v3573_v48 = vor.u32 %v4301_v45, %v3572_v40  ;;  %v4305_v40 = vld [vmem:[%s5989_s3 + $0x134] sm:$0xf0]  ;;  %v4297_v45 = vld [vmem:[%s5989_s3 + $0xe4] sm:$0xf] }
 0x336   :  { %v917_v56 = vadd.f32 %v4450_v42, %v916_v52  ;;  %v3577_v52 = vor.u32 %v4293_v49, %v3574_v50  ;;  %v3516_v49 = vld [vmem:[%s5989_s3 + $0x18] sm:$0xf]  ;;  %v4286_v50 = vld [vmem:[%s5989_s3 + $0x6c] sm:$0xf0] }
 0x337   :  { %v1162_v32 = vadd.f32 %v4452_v28, %v1161_v31  ;;  %v4284_v31 = vld [vmem:[%s5989_s3 + $0x5c] sm:$0xf0] }
 0x338   :  { %v921_v59 = vsel %vm920_vm3, %v4450_v42, %v917_v56  ;;  %v4291_v42 = vld [vmem:[%s5989_s3 + $0xb4] sm:$0xf]  ;;  %v3494_v56 = vld [vmem:[%s5989_s3 + $0x58] sm:$0xf0] }
 0x339   :  { %v926_v61 = vsel %vm923_vm4, %v925_v58, %v921_v59  ;;  %v5282_v33 = vsel %vm1163_vm5, %v4452_v28, %v1162_v32  ;;  %v3561_v47 = vor.u32 %v4291_v42, %v3558_v22  ;;  %v3493_v58 = vor.u32 %v4283_v53, %v3492_v51  ;;  %v3590_v28 = vld [vmem:[%s5989_s3 + $0x128] sm:$0xf0]  ;;  %v4302_v42 = vld [vmem:[%s5989_s3 + $0x11c] sm:$0xf0] }
 0x33a   :  { %v927_v63 = vmul.f32 %v5146_v55, %v926_v61  ;;  %v4267_v55 = vld [vmem:[%s5986_s2 + $0x1a8] sm:$0xf0]  ;;  %s4458_s2 = smov 96   ;;  %v3497_v59 = vor.u32 %v4275_v54, %v3494_v56  ;;  %v3508_v61 = vld [vmem:[%s5989_s3 + $0x10] sm:$0xf]  ;;  %v3593_v30 = vor.u32 %v4295_v27, %v3590_v28  ;;  %v4322_v27 = vld [vmem:[%s5990_s4 + $0x78] sm:$0xff] }
 0x33b   :  { %v3461_v6 = vor.u32 %v4267_v55, %v3460_v3  ;;  %1454 = vmatpush.bf16.msrb.mxu0 %v3561_v47  ;;  %v3513_v3 = vor.u32 %v4277_v1, %v3510_v2  ;;  %1442 = vmatpush.bf16.msra.mxu3 %v3493_v58  ;;  %v4276_v32 = vld [vmem:[%s5989_s3 + $0xc] sm:$0xf]  ;;  %v3604_v22 = vld [vmem:[%s5989_s3 + $0xe0] sm:$0xf]  ;;  %v3581_v47 = vor.u32 %v4302_v42, %v3580_v13  ;;  %v4278_v54 = vld [vmem:[%s5989_s3 + $0x1c] sm:$0xf] }
 0x33c   :  { %v928_v0 = vpack.c.bf16 %v927_v63, %v927_v63  ;;  %v4285_v63 = vld [vmem:[%s5989_s3 + $0x64] sm:$0xf0]  ;;  %v3518_v56 = vld [vmem:[%s5989_s3 + $0x70] sm:$0xf0]  ;;  %v4314_v28 = vld [vmem:[%s5990_s4 + $0x38] sm:$0xff] }
 0x33d   :  { %1138 = vmatpush.bf16.msra.mxu2 %v3461_v6  ;;  %v4289_v58 = vld [vmem:[%s5989_s3 + $0x84] sm:$0xf0]  ;;  %v4329_v13 = vld [vmem:[%s5990_s4 + $0xb0] sm:$0xff] }
 0x33e   :  { %3424 = vmatmul.msk.bf16.vlgmr.msrb.gmra.mxu1 %vm687_vm0, %v928_v0  ;;  %3425 = vmatmul.msk.bf16.vlgmr.msra.gmra.mxu0 %vm687_vm0, %v928_v0  ;;  %v3509_v0 = vor.u32 %v4285_v63, %v3508_v61  ;;  %v3542_v61 = vld [vmem:[%s5989_s3 + $0x88] sm:$0xf0]  ;;  %v3517_v63 = vor.u32 %v4286_v50, %v3516_v49  ;;  %v4317_v42 = vld [vmem:[%s5990_s4 + $0x50] sm:$0xff]  ;;  %v4307_v49 = vld [vmem:[%s5990_s4] sm:$0xff] }
 0x33f   :  { %1493 = vmatpush.bf16.msrb.mxu1 %v3573_v48  ;;  %1455 = vmatpush.bf16.msrb.mxu0 %v3497_v59  ;;  %v4281_v59 = vld [vmem:[%s5989_s3 + $0x34] sm:$0xf]  ;;  %v4354_v50 = vld [vmem:[%s5990_s4 + $0x178] sm:$0xff] }
 0x340   :  { %v3545_v2 = vor.u32 %v4281_v59, %v3542_v61  ;;  %v4352_v59 = vld [vmem:[%s5990_s4 + $0x168] sm:$0xff] }
 0x341   :  { %1506 = vmatpush.bf16.msrb.mxu2 %v3577_v52  ;;  %v3605_v52 = vor.u32 %v4305_v40, %v3604_v22  ;;  %v4328_v22 = vld [vmem:[%s5990_s4 + $0xa8] sm:$0xff] }
 0x342   :  { %v4316_v40 = vld [vmem:[%s5990_s4 + $0x48] sm:$0xff] }
 0x343   :  { %1494 = vmatpush.bf16.msrb.mxu1 %v3509_v0  ;;  %v3521_v0 = vor.u32 %v4278_v54, %v3518_v56  ;;  %v4326_v54 = vld [vmem:[%s5990_s4 + $0x98] sm:$0xff]  ;;  %v4353_v56 = vld [vmem:[%s5990_s4 + $0x170] sm:$0xff]  ;;  %v4332_v61 = vld [vmem:[%s5990_s4 + $0xc8] sm:$0xff] }
 0x345   :  { %1507 = vmatpush.bf16.msrb.mxu2 %v3513_v3  ;;  %v3596_v3 = vld [vmem:[%s5989_s3 + $0xd8] sm:$0xf] }
 0x3bb   :  { %v965_v7 = vpop.f32.mrf.mxu1  ;;  %v978_v8 = vpop.f32.mrf.mxu0 }
 0x3bc   :  { %v982_v9 = vmul.f32 %v965_v7, %v5100_v5  ;;  %v983_v10 = vmul.f32 %v978_v8, %v5097_v62 }
 0x3be   :  { %v984_v11 = vpack.c.bf16 %v982_v9, %v982_v9  ;;  %v985_v12 = vpack.c.bf16 %v983_v10, %v983_v10 }
 0x3c0   :  { %1126 = vmatmul.bf16.vlgmr.msra.gmra.mxu1 %v984_v11  ;;  %1139 = vmatmul.bf16.vlgmr.msra.gmra.mxu2 %v985_v12 }
 0x3c1   :  { %1558 = vmatpush.bf16.msra.mxu2 %v3593_v30 }
 0x3c3   :  { %v967_v14 = vpop.f32.mrf.mxu1  ;;  %v980_v15 = vpop.f32.mrf.mxu0 }
 0x43d   :  { %v1127_v16 = vpop.f32.mrf.mxu1 }
 0x43e   :  { %v1128_v18 = vadd.f32 %v4440_v17, %v1127_v16 }
 0x443   :  { %v1140_v19 = vpop.f32.mrf.mxu2 }
 0x444   :  { %v1141_v20 = vadd.f32 %v1140_v19, %v1128_v18  ;;  %v3564_v18 = vld [vmem:[%s5989_s3 + $0xb8] sm:$0xf]  ;;  %v4300_v19 = vld [vmem:[%s5989_s3 + $0x10c] sm:$0xf0] }
 0x445   :  { %v1129_v23 = vpop.f32.mrf.mxu1 }
 0x446   :  { %1145 = vrot.lane.b32.xlu1 %v1141_v20, %s4458_s2  ;;  %v4292_v20 = vld [vmem:[%s5989_s3 + $0xbc] sm:$0xf]  ;;  %v3565_v23 = vor.u32 %v4300_v19, %v3564_v18  ;;  %v4306_v18 = vld [vmem:[%s5989_s3 + $0x13c] sm:$0xf0]  ;;  %v4298_v19 = vld [vmem:[%s5989_s3 + $0xec] sm:$0xf] }
 0x448   :  { %1467 = vmatpush.bf16.msrb.mxu3 %v3565_v23 }
 0x44b   :  { %v1142_v5 = vpop.f32.mrf.mxu2 }
 0x44c   :  { %v3566_v5 = vld [vmem:[%s5989_s3 + $0x110] sm:$0xf0] }
 0x4b8   :  { %v1146_v62 = vpop.permute.xlu1 %1145 }
 0x4b9   :  { %v1148_v24 = vadd.f32 %v1146_v62, %v4993_v60  ;;  %v3588_v62 = vld [vmem:[%s5989_s3 + $0xd0] sm:$0xf] }
 0x4bb   :  { %1152 = vrot.lane.b32.xlu1 %v1148_v24, %s4457_s7 }
 0x52d   :  { %v1153_v25 = vpop.permute.xlu1 %1152 }
 0x52e   :  { %v1155_v26 = vsel %vm687_vm0, %v1153_v25, 0.0  ;;  %v3569_v25 = vor.u32 %v4292_v20, %v3566_v5  ;;  %v3614_v20 = vld [vmem:[%s5989_s3 + $0x140] sm:$0xf0] }
 0x52f   :  { %1156 = vadd.xlane.f32.xlu2 %v1155_v26  ;;  %v3617_v5 = vor.u32 %v4298_v19, %v3614_v20  ;;  %v4340_v19 = vld [vmem:[%s5990_s4 + $0x108] sm:$0xff] }
 0x530   :  { %1480 = vmatpush.bf16.msra.mxu0 %v3569_v25  ;;  %v4282_v25 = vld [vmem:[%s5989_s3 + $0x3c] sm:$0xf]  ;;  %v4360_v20 = vld [vmem:[%s5990_s4 + $0x1a8] sm:$0xff] }
 0x5a2   :  { %v1157_v34 = vpop.xlane.xlu2 %1156 }
 0x5a3   :  { %v1165_v35 = vmul.f32 %v5282_v33, %v1157_v34  ;;  %v3502_v34 = vld [vmem:[%s5989_s3 + $0x60] sm:$0xf0] }
 0x5a5   :  { %v1166_v60 = vsub.f32 %v1148_v24, %v1165_v35  ;;  %v4303_v24 = vld [vmem:[%s5989_s3 + $0x124] sm:$0xf0]  ;;  %v3501_v35 = vor.u32 %v4284_v31, %v3500_v29  ;;  %v4321_v31 = vld [vmem:[%s5990_s4 + $0x70] sm:$0xff] }
 0x5a6   :  { %v3589_v26 = vor.u32 %v4303_v24, %v3588_v62  ;;  %v3548_v62 = vld [vmem:[%s5989_s3 + $0x38] sm:$0xf]  ;;  %v4290_v24 = vld [vmem:[%s5989_s3 + $0x8c] sm:$0xf0] }
 0x5a7   :  { %v1167_v36 = vmul.f32 %v1166_v60, %v1166_v60  ;;  %1468 = vmatpush.bf16.msrb.mxu3 %v3501_v35  ;;  %v3549_v29 = vor.u32 %v4290_v24, %v3548_v62  ;;  %v4312_v35 = vld [vmem:[%s5990_s4 + $0x28] sm:$0xff]  ;;  %v4359_v62 = vld [vmem:[%s5990_s4 + $0x1a0] sm:$0xff]  ;;  %v4365_v24 = vld [vmem:[%s5990_s4 + $0x1d0] sm:$0xff] }
 0x5a8   :  { %1545 = vmatpush.bf16.msra.mxu1 %v3589_v26  ;;  %v3550_v26 = vld [vmem:[%s5989_s3 + $0x90] sm:$0xf0] }
 0x5a9   :  { %1169 = vrot.lane.b32.xlu2 %v1167_v36, %s4457_s7  ;;  %v3524_v36 = vld [vmem:[%s5989_s3 + $0x20] sm:$0xf]  ;;  %v3553_v30 = vor.u32 %v4282_v25, %v3550_v26  ;;  %v4358_v25 = vld [vmem:[%s5990_s4 + $0x198] sm:$0xff]  ;;  %v4364_v26 = vld [vmem:[%s5990_s4 + $0x1c8] sm:$0xff] }
 0x5b1   :  { %1190 = vrot.lane.b32.xlu2 %v4441_v37, %s4458_s2  ;;  %v4287_v37 = vld [vmem:[%s5989_s3 + $0x74] sm:$0xf0] }
 0x5b9   :  { %1196 = vrot.lane.b32.xlu2 %v4442_v21, %s4458_s2  ;;  %v4279_v21 = vld [vmem:[%s5989_s3 + $0x24] sm:$0xf] }
 0x603   :  { %v1170_v38 = vpop.permute.xlu2 %1169 }
 0x604   :  { %v1172_v39 = vsel %vm687_vm0, %v1170_v38, 0.0  ;;  %v3525_v38 = vor.u32 %v4287_v37, %v3524_v36  ;;  %v4311_v36 = vld [vmem:[%s5990_s4 + $0x20] sm:$0xff]  ;;  %v4338_v37 = vld [vmem:[%s5990_s4 + $0xf8] sm:$0xff] }
 0x605   :  { %1173 = vadd.xlane.f32.xlu1 %v1172_v39  ;;  %v3526_v39 = vld [vmem:[%s5989_s3 + $0x78] sm:$0xf0] }
 0x606   :  { %v3529_v41 = vor.u32 %v4279_v21, %v3526_v39  ;;  %1546 = vmatpush.bf16.msra.mxu1 %v3525_v38  ;;  %v4330_v21 = vld [vmem:[%s5990_s4 + $0xb8] sm:$0xff] }
 0x607   :  { %v4318_v38 = vld [vmem:[%s5990_s4 + $0x58] sm:$0xff] }
 0x608   :  { %1559 = vmatpush.bf16.msra.mxu2 %v3529_v41  ;;  %v4310_v39 = vld [vmem:[%s5990_s4 + $0x18] sm:$0xff]  ;;  %v4337_v41 = vld [vmem:[%s5990_s4 + $0xf0] sm:$0xff] }
 0x60b   :  { %v1191_v7 = vpop.permute.xlu2 %1190 }
 0x613   :  { %v1197_v14 = vpop.permute.xlu2 %1196 }
 0x678   :  { %v1174_v43 = vpop.xlane.xlu1 %1173 }
 0x679   :  { %v1175_v46 = vmul.f32 %v1174_v43, %v5282_v33  ;;  %v4294_v43 = vld [vmem:[%s5989_s3 + $0xcc] sm:$0xf] }
 0x67a   :  { %v3585_v48 = vor.u32 %v4294_v43, %v3582_v44  ;;  %v4309_v43 = vld [vmem:[%s5990_s4 + $0x10] sm:$0xff]  ;;  %v4336_v44 = vld [vmem:[%s5990_s4 + $0xe8] sm:$0xff] }
 0x67b   :  { %v1176_v57 = vadd.f32 1e-05, %v1175_v46  ;;  %v3606_v46 = vld [vmem:[%s5989_s3 + $0x138] sm:$0xf0] }
 0x67c   :  { %v3609_v53 = vor.u32 %v4297_v45, %v3606_v46  ;;  %v4308_v45 = vld [vmem:[%s5990_s4 + $0x8] sm:$0xff]  ;;  %v4335_v46 = vld [vmem:[%s5990_s4 + $0xe0] sm:$0xff] }
 0x67d   :  { %4453 = vrsqrt.f32 %v1176_v57  ;;  %vm1183_vm7 = vweird.f32 %v1176_v57 }
 0x683   :  { %v4454_v4 = vpop.eup %4453 }
 0x684   :  { %v1178_v55 = vmul.f32 %v4454_v4, %v1176_v57  ;;  %vm1184_vm6 = vweird.f32 %v4454_v4  ;;  %v3540_v57 = vld [vmem:[%s5989_s3 + $0x30] sm:$0xf] }
 0x685   :  { %vm1185_vm8 = vmor %vm1183_vm7, %vm1184_vm6  ;;  %v3541_v1 = vor.u32 %v4289_v58, %v3540_v57  ;;  %v4333_v57 = vld [vmem:[%s5990_s4 + $0xd0] sm:$0xff] }
 0x686   :  { %v1179_v6 = vmul.f32 %v4454_v4, %v1178_v55  ;;  %v4296_v55 = vld [vmem:[%s5989_s3 + $0xdc] sm:$0xf]  ;;  %v4345_v58 = vld [vmem:[%s5990_s4 + $0x130] sm:$0xff] }
 0x688   :  { %v1180_v8 = vmul.f32 0.5, %v1179_v6  ;;  %v3598_v6 = vld [vmem:[%s5989_s3 + $0x130] sm:$0xf0] }
 0x68a   :  { %v1181_v9 = vsub.f32 1.5, %v1180_v8  ;;  %v3601_v8 = vor.u32 %v4296_v55, %v3598_v6  ;;  %v4323_v55 = vld [vmem:[%s5990_s4 + $0x80] sm:$0xff]  ;;  %v4350_v6 = vld [vmem:[%s5990_s4 + $0x158] sm:$0xff] }
 0x68c   :  { %v1182_v10 = vmul.f32 %v4454_v4, %v1181_v9  ;;  %v3532_v9 = vld [vmem:[%s5989_s3 + $0x28] sm:$0xf] }
 0x68e   :  { %v1186_v11 = vsel %vm1185_vm8, %v4454_v4, %v1182_v10  ;;  %v4304_v4 = vld [vmem:[%s5989_s3 + $0x12c] sm:$0xf0]  ;;  %v4288_v10 = vld [vmem:[%s5989_s3 + $0x7c] sm:$0xf0] }
 0x68f   :  { %v1187_v12 = vmul.f32 %v1186_v11, %v1166_v60  ;;  %v3505_v60 = vor.u32 %v4276_v32, %v3502_v34  ;;  %v4280_v11 = vld [vmem:[%s5989_s3 + $0x2c] sm:$0xf]  ;;  %v4313_v32 = vld [vmem:[%s5990_s4 + $0x30] sm:$0xff] }
 0x690   :  { %v4320_v34 = vld [vmem:[%s5990_s4 + $0x68] sm:$0xff] }
 0x691   :  { %v1193_v15 = vmul.f32 %v1191_v7, %v1187_v12  ;;  %1481 = vmatpush.bf16.msra.mxu0 %v3505_v60  ;;  %v3597_v7 = vor.u32 %v4304_v4, %v3596_v3  ;;  %v3534_v12 = vld [vmem:[%s5989_s3 + $0x80] sm:$0xf0]  ;;  %v4370_v3 = vld [vmem:[%s5990_s4 + $0x1f8] sm:$0xff] }
 0x692   :  { %v4319_v60 = vld [vmem:[%s5990_s4 + $0x60] sm:$0xff] }
 0x693   :  { %v5344_v16 = vadd.f32 %v1197_v14, %v1193_v15  ;;  %v3533_v14 = vor.u32 %v4288_v10, %v3532_v9  ;;  %v3537_v15 = vor.u32 %v4280_v11, %v3534_v12  ;;  %v4343_v4 = vld [vmem:[%s5990_s4 + $0x120] sm:$0xff]  ;;  %v4342_v9 = vld [vmem:[%s5990_s4 + $0x118] sm:$0xff]  ;;  %v4348_v11 = vld [vmem:[%s5990_s4 + $0x148] sm:$0xff] }
 0x694   :  { %v4362_v10 = vld [vmem:[%s5990_s4 + $0x1b8] sm:$0xff]  ;;  %v4368_v12 = vld [vmem:[%s5990_s4 + $0x1e8] sm:$0xff] }
 0x695   :  { %v1200_v17 = vpack.c.bf16 %v5344_v16, %v5344_v16 }
 0x697   :  { %1270 = vrot.lane.b32.xlu2 %v1200_v17, %s4457_s7  ;;  %v3612_v17 = vld [vmem:[%s5989_s3 + $0xe8] sm:$0xf] }
 0x698   :  { %v3613_v23 = vor.u32 %v4306_v18, %v3612_v17  ;;  %v4347_v17 = vld [vmem:[%s5990_s4 + $0x140] sm:$0xff] }
 0x699   :  { %v4367_v18 = vld [vmem:[%s5990_s4 + $0x1e0] sm:$0xff] }
 0x6f1   :  { %v5427_v51 = vpop.permute.xlu2 %1270 }
 0x6f2   :  { %3618 = vmatmul.msk.bf16.vlgmr.msra.gmra.mxu3 %vm687_vm0, %v5427_v51  ;;  %3619 = vmatmul.msk.bf16.vlgmr.msrb.gmra.mxu0 %vm687_vm0, %v5427_v51 }
 0x6f3   :  { %3622 = vmatmul.msk.bf16.vlgmr.msrb.gmra.mxu1 %vm687_vm0, %v5427_v51  ;;  %3623 = vmatmul.msk.bf16.vlgmr.msrb.gmra.mxu2 %vm687_vm0, %v5427_v51 }
 0x6f4   :  { %1519 = vmatpush.bf16.msra.mxu3 %v3581_v47  ;;  %1532 = vmatpush.bf16.msrb.mxu0 %v3585_v48  ;;  %v4327_v47 = vld [vmem:[%s5990_s4 + $0xa0] sm:$0xff] }
 0x6f5   :  { %1597 = vmatpush.bf16.msrb.mxu1 %v3605_v52  ;;  %1610 = vmatpush.bf16.msrb.mxu2 %v3609_v53  ;;  %v4315_v48 = vld [vmem:[%s5990_s4 + $0x40] sm:$0xff]  ;;  %v4334_v52 = vld [vmem:[%s5990_s4 + $0xd8] sm:$0xff] }
 0x6f6   :  { %v4346_v53 = vld [vmem:[%s5990_s4 + $0x138] sm:$0xff] }
 0x6f8   :  { %1520 = vmatpush.bf16.msra.mxu3 %v3517_v63  ;;  %1533 = vmatpush.bf16.msrb.mxu0 %v3521_v0  ;;  %v4344_v63 = vld [vmem:[%s5990_s4 + $0x128] sm:$0xff] }
 0x6f9   :  { %1598 = vmatpush.bf16.msrb.mxu1 %v3541_v1  ;;  %1611 = vmatpush.bf16.msrb.mxu2 %v3545_v2  ;;  %v4324_v0 = vld [vmem:[%s5990_s4 + $0x88] sm:$0xff]  ;;  %v4351_v1 = vld [vmem:[%s5990_s4 + $0x160] sm:$0xff] }
 0x6fa   :  { %v4331_v2 = vld [vmem:[%s5990_s4 + $0xc0] sm:$0xff] }
 0x702   :  { %3620 = vmatmul.msk.bf16.vlgmr.msrb.gmra.mxu3 %vm687_vm0, %v5427_v51  ;;  %3621 = vmatmul.msk.bf16.vlgmr.msra.gmra.mxu0 %vm687_vm0, %v5427_v51 }
 0x703   :  { %3626 = vmatmul.msk.bf16.vlgmr.msra.gmra.mxu1 %vm687_vm0, %v5427_v51  ;;  %3627 = vmatmul.msk.bf16.vlgmr.msra.gmra.mxu2 %vm687_vm0, %v5427_v51 }
 0x704   :  { %1571 = vmatpush.bf16.msrb.mxu3 %v3597_v7  ;;  %1584 = vmatpush.bf16.msra.mxu0 %v3601_v8  ;;  %v4369_v7 = vld [vmem:[%s5990_s4 + $0x1f0] sm:$0xff] }
 0x705   :  { %2716 = vmatpush.bf16.msra.mxu2 %v4322_v27  ;;  %2703 = vmatpush.bf16.msra.mxu1 %v4314_v28  ;;  %v4349_v8 = vld [vmem:[%s5990_s4 + $0x150] sm:$0xff]  ;;  %v4363_v28 = vld [vmem:[%s5990_s4 + $0x1c0] sm:$0xff] }
 0x706   :  { %v4357_v27 = vld [vmem:[%s5990_s4 + $0x190] sm:$0xff] }
 0x708   :  { %1572 = vmatpush.bf16.msrb.mxu3 %v3533_v14  ;;  %1585 = vmatpush.bf16.msra.mxu0 %v3537_v15  ;;  %v4341_v14 = vld [vmem:[%s5990_s4 + $0x110] sm:$0xff] }
 0x709   :  { %2717 = vmatpush.bf16.msra.mxu2 %v4321_v31  ;;  %2704 = vmatpush.bf16.msra.mxu1 %v4313_v32  ;;  %v4361_v15 = vld [vmem:[%s5990_s4 + $0x1b0] sm:$0xff]  ;;  %v4355_v31 = vld [vmem:[%s5990_s4 + $0x180] sm:$0xff] }
 0x70d   :  { %2718 = vmatpush.bf16.msra.mxu2 %v4320_v34  ;;  %2705 = vmatpush.bf16.msra.mxu1 %v4312_v35 }
 0x711   :  { %2719 = vmatpush.bf16.msra.mxu2 %v4319_v60  ;;  %2706 = vmatpush.bf16.msra.mxu1 %v4311_v36 }
 0x712   :  { %3624 = vmatmul.msk.bf16.vlgmr.msra.gmra.mxu3 %vm687_vm0, %v5427_v51  ;;  %3625 = vmatmul.msk.bf16.vlgmr.msrb.gmra.mxu0 %vm687_vm0, %v5427_v51 }
 0x713   :  { %3630 = vmatmul.msk.bf16.vlgmr.msrb.gmra.mxu1 %vm687_vm0, %v5427_v51  ;;  %3631 = vmatmul.msk.bf16.vlgmr.msrb.gmra.mxu2 %vm687_vm0, %v5427_v51 }
 0x714   :  { %1623 = vmatpush.bf16.msra.mxu3 %v3613_v23  ;;  %1636 = vmatpush.bf16.msrb.mxu0 %v3617_v5  ;;  %v4366_v23 = vld [vmem:[%s5990_s4 + $0x1d8] sm:$0xff]  ;;  %v4339_v5 = vld [vmem:[%s5990_s4 + $0x100] sm:$0xff] }
 0x715   :  { %2720 = vmatpush.bf16.msra.mxu2 %v4318_v38  ;;  %2707 = vmatpush.bf16.msra.mxu1 %v4310_v39 }
 0x718   :  { %1624 = vmatpush.bf16.msra.mxu3 %v3549_v29  ;;  %1637 = vmatpush.bf16.msrb.mxu0 %v3553_v30  ;;  %v4356_v29 = vld [vmem:[%s5990_s4 + $0x188] sm:$0xff] }
 0x719   :  { %2721 = vmatpush.bf16.msra.mxu2 %v4317_v42  ;;  %2708 = vmatpush.bf16.msra.mxu1 %v4309_v43  ;;  %v5719_v30 = vld [vmem:[%s5988_s5 + $0x8] sm:$0xff]  ;;  %v4385_v43 = vld [vmem:[%s5990_s4 + $0x270] sm:$0xff] }
 0x71a   :  { %v1238_v32 = vperm.slane %v5719_v30, 1 }
 0x71d   :  { %2722 = vmatpush.bf16.msra.mxu2 %v4316_v40  ;;  %2709 = vmatpush.bf16.msra.mxu1 %v4308_v45  ;;  %v4378_v45 = vld [vmem:[%s5990_s4 + $0x238] sm:$0xff] }
 0x721   :  { %2723 = vmatpush.bf16.msra.mxu2 %v4315_v48  ;;  %2710 = vmatpush.bf16.msra.mxu1 %v4307_v49  ;;  %v1240_v49 = vperm.slane %v5719_v30, 3 }
 0x722   :  { %3628 = vmatmul.msk.bf16.vlgmr.msrb.gmra.mxu3 %vm687_vm0, %v5427_v51  ;;  %3629 = vmatmul.msk.bf16.vlgmr.msra.gmra.mxu0 %vm687_vm0, %v5427_v51 }
 0x723   :  { %2742 = vmatpush.bf16.msra.mxu0 %v4338_v37  ;;  %2729 = vmatpush.bf16.msrb.mxu3 %v4330_v21  ;;  %v1237_v37 = vperm.slane %v5719_v30, 0  ;;  %v4386_v21 = vld [vmem:[%s5990_s4 + $0x278] sm:$0xff] }
 0x725   :  { %2768 = vmatpush.bf16.msrb.mxu2 %v4354_v50  ;;  %2755 = vmatpush.bf16.msrb.mxu1 %v4346_v53  ;;  %v1241_v53 = vperm.slane %v5719_v30, 4 }
 0x727   :  { %2743 = vmatpush.bf16.msra.mxu0 %v4337_v41  ;;  %2730 = vmatpush.bf16.msrb.mxu3 %v4329_v13 }
 0x729   :  { %2769 = vmatpush.bf16.msrb.mxu2 %v4353_v56  ;;  %2756 = vmatpush.bf16.msrb.mxu1 %v4345_v58 }
 0x72b   :  { %2744 = vmatpush.bf16.msra.mxu0 %v4336_v44  ;;  %2731 = vmatpush.bf16.msrb.mxu3 %v4328_v22  ;;  %v1242_v22 = vperm.slane %v5719_v30, 5 }
 0x72d   :  { %2770 = vmatpush.bf16.msrb.mxu2 %v4352_v59  ;;  %2757 = vmatpush.bf16.msrb.mxu1 %v4344_v63 }
 0x72f   :  { %2745 = vmatpush.bf16.msra.mxu0 %v4335_v46  ;;  %2732 = vmatpush.bf16.msrb.mxu3 %v4327_v47  ;;  %v4384_v47 = vld [vmem:[%s5990_s4 + $0x268] sm:$0xff] }
 0x731   :  { %2771 = vmatpush.bf16.msrb.mxu2 %v4351_v1  ;;  %2758 = vmatpush.bf16.msrb.mxu1 %v4343_v4  ;;  %v1239_v1 = vperm.slane %v5719_v30, 2 }
 0x732   :  { %3632 = vmatmul.msk.bf16.vlgmr.msra.gmra.mxu3 %vm687_vm0, %v5427_v51  ;;  %3633 = vmatmul.msk.bf16.vlgmr.msrb.gmra.mxu0 %vm687_vm0, %v5427_v51  ;;  %v4325_v51 = vld [vmem:[%s5990_s4 + $0x90] sm:$0xff] }
 0x733   :  { %2746 = vmatpush.bf16.msra.mxu0 %v4334_v52  ;;  %2733 = vmatpush.bf16.msrb.mxu3 %v4326_v54  ;;  %v4377_v52 = vld [vmem:[%s5990_s4 + $0x230] sm:$0xff] }
 0x735   :  { %2772 = vmatpush.bf16.msrb.mxu2 %v4350_v6  ;;  %2759 = vmatpush.bf16.msrb.mxu1 %v4342_v9 }
 0x737   :  { %2747 = vmatpush.bf16.msra.mxu0 %v4333_v57  ;;  %2734 = vmatpush.bf16.msrb.mxu3 %v4325_v51  ;;  %v4383_v57 = vld [vmem:[%s5990_s4 + $0x260] sm:$0xff] }
 0x739   :  { %2773 = vmatpush.bf16.msrb.mxu2 %v4349_v8  ;;  %2760 = vmatpush.bf16.msrb.mxu1 %v4341_v14  ;;  %v4381_v14 = vld [vmem:[%s5990_s4 + $0x250] sm:$0xff] }
 0x73b   :  { %2748 = vmatpush.bf16.msra.mxu0 %v4332_v61  ;;  %2735 = vmatpush.bf16.msrb.mxu3 %v4324_v0  ;;  %v4376_v61 = vld [vmem:[%s5990_s4 + $0x228] sm:$0xff] }
 0x73d   :  { %2774 = vmatpush.bf16.msrb.mxu2 %v4348_v11  ;;  %2761 = vmatpush.bf16.msrb.mxu1 %v4340_v19  ;;  %v5765_v11 = vld [vmem:[%s5988_s5 + $0x10] sm:$0xff] }
 0x73f   :  { %2749 = vmatpush.bf16.msra.mxu0 %v4331_v2  ;;  %2736 = vmatpush.bf16.msrb.mxu3 %v4323_v55  ;;  %v4382_v2 = vld [vmem:[%s5990_s4 + $0x258] sm:$0xff] }
 0x741   :  { %2775 = vmatpush.bf16.msrb.mxu2 %v4347_v17  ;;  %2762 = vmatpush.bf16.msrb.mxu1 %v4339_v5 }
 0x743   :  { %2794 = vmatpush.bf16.msrb.mxu0 %v4370_v3  ;;  %2781 = vmatpush.bf16.msra.mxu3 %v4362_v10  ;;  %v4402_v3 = vld [vmem:[%s5990_s4 + $0x2f8] sm:$0xff] }
 0x747   :  { %2795 = vmatpush.bf16.msrb.mxu0 %v4369_v7  ;;  %2782 = vmatpush.bf16.msra.mxu3 %v4361_v15  ;;  %v4375_v7 = vld [vmem:[%s5990_s4 + $0x220] sm:$0xff]  ;;  %v4401_v15 = vld [vmem:[%s5990_s4 + $0x2f0] sm:$0xff] }
 0x74b   :  { %2796 = vmatpush.bf16.msrb.mxu0 %v4368_v12  ;;  %2783 = vmatpush.bf16.msra.mxu3 %v4360_v20  ;;  %v4374_v20 = vld [vmem:[%s5990_s4 + $0x218] sm:$0xff] }
 0x74f   :  { %2797 = vmatpush.bf16.msrb.mxu0 %v4367_v18  ;;  %2784 = vmatpush.bf16.msra.mxu3 %v4359_v62  ;;  %v1246_v18 = vperm.slane %v5765_v11, 1 }
 0x753   :  { %2798 = vmatpush.bf16.msrb.mxu0 %v4366_v23  ;;  %2785 = vmatpush.bf16.msra.mxu3 %v4358_v25  ;;  %v4394_v23 = vld [vmem:[%s5990_s4 + $0x2b8] sm:$0xff]  ;;  %v4400_v25 = vld [vmem:[%s5990_s4 + $0x2e8] sm:$0xff] }
 0x757   :  { %2799 = vmatpush.bf16.msrb.mxu0 %v4365_v24  ;;  %2786 = vmatpush.bf16.msra.mxu3 %v4357_v27  ;;  %v4380_v24 = vld [vmem:[%s5990_s4 + $0x248] sm:$0xff]  ;;  %v1244_v27 = vperm.slane %v5719_v30, 7 }
 0x75b   :  { %2800 = vmatpush.bf16.msrb.mxu0 %v4364_v26  ;;  %2787 = vmatpush.bf16.msra.mxu3 %v4356_v29  ;;  %v4373_v29 = vld [vmem:[%s5990_s4 + $0x210] sm:$0xff] }
 0x75f   :  { %2801 = vmatpush.bf16.msrb.mxu0 %v4363_v28  ;;  %2788 = vmatpush.bf16.msra.mxu3 %v4355_v31  ;;  %v4393_v31 = vld [vmem:[%s5990_s4 + $0x2b0] sm:$0xff] }
 0x76f   :  { %v1457_v34 = vpop.f32.mrf.mxu0 }
 0x770   :  { %v1458_v35 = vadd.f32 %v1457_v34, %v1238_v32  ;;  %v1496_v60 = vpop.f32.mrf.mxu1  ;;  %v1245_v34 = vperm.slane %v5765_v11, 0 }
 0x771   :  { %v1497_v63 = vadd.f32 %v1496_v60, %v1241_v53  ;;  %v4379_v60 = vld [vmem:[%s5990_s4 + $0x240] sm:$0xff] }
 0x772   :  { %v1644_v36 = vmax.f32 %v1458_v35, 0.0 }
 0x773   :  { %v1647_v8 = vmax.f32 %v1497_v63, 0.0  ;;  %v4409_v63 = vld [vmem:[%s5990_s4 + $0x330] sm:$0xff] }
 0x774   :  { %v1660_v38 = vpack.c.bf16 %v1644_v36, %v1644_v36  ;;  %v4399_v36 = vld [vmem:[%s5990_s4 + $0x2e0] sm:$0xff] }
 0x775   :  { %v1444_v39 = vpop.f32.mrf.mxu3  ;;  %v1663_v5 = vpack.c.bf16 %v1647_v8, %v1647_v8 }
 0x776   :  { %v1445_v41 = vadd.f32 %v1444_v39, %v1237_v37  ;;  %v1509_v13 = vpop.f32.mrf.mxu2  ;;  %2724 = vmatmul.bf16.vlgmr.msra.gmra.mxu2 %v1660_v38  ;;  %v4418_v39 = vld [vmem:[%s5990_s4 + $0x378] sm:$0xff] }
 0x777   :  { %2820 = vmatpush.bf16.msra.mxu2 %v4386_v21  ;;  %v1459_v42 = vpop.f32.mrf.mxu0  ;;  %v1510_v48 = vadd.f32 %v1509_v13, %v1242_v22  ;;  %v4392_v13 = vld [vmem:[%s5990_s4 + $0x2a8] sm:$0xff]  ;;  %v4398_v22 = vld [vmem:[%s5990_s4 + $0x2d8] sm:$0xff] }
 0x778   :  { %v1643_v44 = vmax.f32 %v1445_v41, 0.0  ;;  %v1498_v40 = vpop.f32.mrf.mxu1  ;;  %v4372_v41 = vld [vmem:[%s5990_s4 + $0x208] sm:$0xff] }
 0x779   :  { %v1648_v58 = vmax.f32 %v1510_v48, 0.0  ;;  %v4391_v48 = vld [vmem:[%s5990_s4 + $0x2a0] sm:$0xff] }
 0x77a   :  { %v1659_v46 = vpack.c.bf16 %v1643_v44, %v1643_v44 }
 0x77b   :  { %2821 = vmatpush.bf16.msra.mxu2 %v4385_v43  ;;  %v1664_v4 = vpack.c.bf16 %v1648_v58, %v1648_v58  ;;  %v1243_v43 = vperm.slane %v5719_v30, 6  ;;  %v4371_v30 = vld [vmem:[%s5990_s4 + $0x200] sm:$0xff] }
 0x77c   :  { %2711 = vmatmul.bf16.vlgmr.msra.gmra.mxu1 %v1659_v46  ;;  %v4417_v46 = vld [vmem:[%s5990_s4 + $0x370] sm:$0xff] }
 0x77d   :  { %2807 = vmatpush.bf16.msra.mxu1 %v4378_v45  ;;  %v1446_v50 = vpop.f32.mrf.mxu3 }
 0x77e   :  { %v1511_v54 = vpop.f32.mrf.mxu2 }
 0x77f   :  { %2822 = vmatpush.bf16.msra.mxu2 %v4384_v47  ;;  %v1483_v56 = vpop.f32.mrf.mxu0 }
 0x780   :  { %v1484_v51 = vadd.f32 %v1483_v56, %v1240_v49  ;;  %v5747_v59 = vpop.f32.mrf.mxu1  ;;  %v4397_v56 = vld [vmem:[%s5990_s4 + $0x2d0] sm:$0xff] }
 0x781   :  { %2808 = vmatpush.bf16.msra.mxu1 %v4377_v52  ;;  %v1549_v44 = vadd.f32 %v5747_v59, %v1245_v34  ;;  %v4410_v52 = vld [vmem:[%s5990_s4 + $0x338] sm:$0xff]  ;;  %v4432_v34 = vld [vmem:[%s5990_s4 + $0x3e8] sm:$0xff] }
 0x782   :  { %v1646_v0 = vmax.f32 %v1484_v51, 0.0  ;;  %v4416_v51 = vld [vmem:[%s5990_s4 + $0x368] sm:$0xff]  ;;  %v4390_v59 = vld [vmem:[%s5990_s4 + $0x298] sm:$0xff] }
 0x783   :  { %2823 = vmatpush.bf16.msra.mxu2 %v4383_v57  ;;  %v1651_v53 = vmax.f32 %v1549_v44, 0.0  ;;  %v4424_v44 = vld [vmem:[%s5990_s4 + $0x3a8] sm:$0xff] }
 0x784   :  { %v1662_v55 = vpack.c.bf16 %v1646_v0, %v1646_v0 }
 0x785   :  { %2809 = vmatpush.bf16.msra.mxu1 %v4376_v61  ;;  %v1470_v6 = vpop.f32.mrf.mxu3  ;;  %v1667_v0 = vpack.c.bf16 %v1651_v53, %v1651_v53 }
 0x786   :  { %v1471_v9 = vadd.f32 %v1470_v6, %v1239_v1  ;;  %v1561_v10 = vpop.f32.mrf.mxu2  ;;  %2750 = vmatmul.bf16.vlgmr.msra.gmra.mxu0 %v1662_v55  ;;  %2776 = vmatmul.bf16.vlgmr.msrb.gmra.mxu2 %v1664_v4  ;;  %v4396_v1 = vld [vmem:[%s5990_s4 + $0x2c8] sm:$0xff]  ;;  %v4389_v55 = vld [vmem:[%s5990_s4 + $0x290] sm:$0xff] }
 0x787   :  { %2824 = vmatpush.bf16.msra.mxu2 %v4382_v2  ;;  %2846 = vmatpush.bf16.msra.mxu0 %v4402_v3  ;;  %v1485_v12 = vpop.f32.mrf.mxu0  ;;  %v1562_v26 = vadd.f32 %v1561_v10, %v1246_v18  ;;  %v1248_v2 = vperm.slane %v5765_v11, 3  ;;  %v4415_v3 = vld [vmem:[%s5990_s4 + $0x360] sm:$0xff]  ;;  %v1247_v18 = vperm.slane %v5765_v11, 2 }
 0x788   :  { %v1645_v17 = vmax.f32 %v1471_v9, 0.0  ;;  %v1550_v19 = vpop.f32.mrf.mxu1  ;;  %v4395_v9 = vld [vmem:[%s5990_s4 + $0x2c0] sm:$0xff]  ;;  %v4414_v12 = vld [vmem:[%s5990_s4 + $0x358] sm:$0xff] }
 0x789   :  { %2810 = vmatpush.bf16.msra.mxu1 %v4375_v7  ;;  %v1652_v37 = vmax.f32 %v1562_v26, 0.0  ;;  %v4408_v7 = vld [vmem:[%s5990_s4 + $0x328] sm:$0xff]  ;;  %v4407_v19 = vld [vmem:[%s5990_s4 + $0x320] sm:$0xff] }
 0x78a   :  { %v1661_v62 = vpack.c.bf16 %v1645_v17, %v1645_v17 }
 0x78b   :  { %2825 = vmatpush.bf16.msra.mxu2 %v4381_v14  ;;  %2847 = vmatpush.bf16.msra.mxu0 %v4401_v15  ;;  %v1668_v40 = vpack.c.bf16 %v1652_v37, %v1652_v37  ;;  %v4434_v14 = vld [vmem:[%s5990_s4 + $0x3f8] sm:$0xff]  ;;  %v4388_v15 = vld [vmem:[%s5990_s4 + $0x288] sm:$0xff]  ;;  %v4425_v37 = vld [vmem:[%s5990_s4 + $0x3b0] sm:$0xff] }
 0x78c   :  { %2737 = vmatmul.bf16.vlgmr.msrb.gmra.mxu3 %v1661_v62  ;;  %2763 = vmatmul.bf16.vlgmr.msrb.gmra.mxu1 %v1663_v5  ;;  %v4433_v5 = vld [vmem:[%s5990_s4 + $0x3f0] sm:$0xff]  ;;  %v1250_v62 = vperm.slane %v5765_v11, 5 }
 0x78d   :  { %2811 = vmatpush.bf16.msra.mxu1 %v4374_v20  ;;  %2833 = vmatpush.bf16.msrb.mxu3 %v4394_v23  ;;  %v1472_v28 = vpop.f32.mrf.mxu3  ;;  %v4413_v23 = vld [vmem:[%s5990_s4 + $0x350] sm:$0xff] }
 0x78e   :  { %v1563_v32 = vpop.f32.mrf.mxu2  ;;  %v4426_v28 = vld [vmem:[%s5990_s4 + $0x3b8] sm:$0xff] }
 0x78f   :  { %2826 = vmatpush.bf16.msra.mxu2 %v4380_v24  ;;  %2848 = vmatpush.bf16.msra.mxu0 %v4400_v25  ;;  %v1535_v35 = vpop.f32.mrf.mxu0  ;;  %v4387_v25 = vld [vmem:[%s5990_s4 + $0x280] sm:$0xff]  ;;  %v4412_v32 = vld [vmem:[%s5990_s4 + $0x348] sm:$0xff] }
 0x790   :  { %v1536_v21 = vadd.f32 %v1535_v35, %v1244_v27  ;;  %v5800_v38 = vpop.f32.mrf.mxu1  ;;  %v4406_v27 = vld [vmem:[%s5990_s4 + $0x318] sm:$0xff] }
 0x791   :  { %2812 = vmatpush.bf16.msra.mxu1 %v4373_v29  ;;  %2834 = vmatpush.bf16.msrb.mxu3 %v4393_v31 }
 0x792   :  { %v1650_v42 = vmax.f32 %v1536_v21, 0.0  ;;  %v1249_v21 = vperm.slane %v5765_v11, 4 }
 0x793   :  { %2827 = vmatpush.bf16.msra.mxu2 %v4379_v60  ;;  %2849 = vmatpush.bf16.msra.mxu0 %v4399_v36  ;;  %v4405_v36 = vld [vmem:[%s5990_s4 + $0x310] sm:$0xff] }
 0x794   :  { %v1666_v45 = vpack.c.bf16 %v1650_v42, %v1650_v42 }
 0x795   :  { %2813 = vmatpush.bf16.msra.mxu1 %v4372_v41  ;;  %2835 = vmatpush.bf16.msrb.mxu3 %v4392_v13  ;;  %v1522_v47 = vpop.f32.mrf.mxu3  ;;  %v4431_v41 = vld [vmem:[%s5990_s4 + $0x3e0] sm:$0xff] }
 0x796   :  { %v1523_v49 = vadd.f32 %v1522_v47, %v1243_v43  ;;  %v5825_v50 = vpop.f32.mrf.mxu2  ;;  %2802 = vmatmul.bf16.vlgmr.msrb.gmra.mxu0 %v1666_v45  ;;  %2828 = vmatmul.bf16.vlgmr.msra.gmra.mxu2 %v1668_v40  ;;  %v4404_v43 = vld [vmem:[%s5990_s4 + $0x308] sm:$0xff]  ;;  %v4430_v45 = vld [vmem:[%s5990_s4 + $0x3d8] sm:$0xff]  ;;  %v4403_v47 = vld [vmem:[%s5990_s4 + $0x300] sm:$0xff] }
 0x797   :  { %2872 = vmatpush.bf16.msrb.mxu2 %v4418_v39  ;;  %2850 = vmatpush.bf16.msra.mxu0 %v4398_v22  ;;  %v1537_v54 = vpop.f32.mrf.mxu0  ;;  %v1614_v35 = vadd.f32 %v5825_v50, %v1250_v62  ;;  %v4411_v39 = vld [vmem:[%s5990_s4 + $0x340] sm:$0xff]  ;;  %v1601_v22 = vadd.f32 %v5800_v38, %v1249_v21  ;;  %v4429_v38 = vld [vmem:[%s5990_s4 + $0x3d0] sm:$0xff]  ;;  %v4443_v62 = vld [vmem:[%s5988_s5 + $0x1e] ss:$0 sm:$0xff] }
 0x798   :  { %v1649_v57 = vmax.f32 %v1523_v49, 0.0  ;;  %v1602_v58 = vpop.f32.mrf.mxu1  ;;  %v1252_v49 = vperm.slane %v5765_v11, 7 }
 0x799   :  { %2814 = vmatpush.bf16.msra.mxu1 %v4371_v30  ;;  %2836 = vmatpush.bf16.msrb.mxu3 %v4391_v48  ;;  %v1656_v13 = vmax.f32 %v1614_v35, 0.0  ;;  %v4423_v30 = vld [vmem:[%s5990_s4 + $0x3a0] sm:$0xff]  ;;  %v1655_v48 = vmax.f32 %v1601_v22, 0.0  ;;  %v4421_v58 = vld [vmem:[%s5990_s4 + $0x390] sm:$0xff] }
 0x79a   :  { %v1665_v61 = vpack.c.bf16 %v1649_v57, %v1649_v57 }
 0x79b   :  { %2873 = vmatpush.bf16.msrb.mxu2 %v4417_v46  ;;  %2851 = vmatpush.bf16.msra.mxu0 %v4397_v56  ;;  %v1672_v46 = vpack.c.bf16 %v1656_v13, %v1656_v13  ;;  %v1671_v53 = vpack.c.bf16 %v1655_v48, %v1655_v48  ;;  %v4428_v56 = vld [vmem:[%s5990_s4 + $0x3c8] sm:$0xff] }
 0x79c   :  { %2789 = vmatmul.bf16.vlgmr.msra.gmra.mxu3 %v1665_v61  ;;  %2815 = vmatmul.bf16.vlgmr.msra.gmra.mxu1 %v1667_v0  ;;  %v4420_v0 = vld [vmem:[%s5990_s4 + $0x388] sm:$0xff] }
 0x79d   :  { %2859 = vmatpush.bf16.msrb.mxu1 %v4410_v52  ;;  %2837 = vmatpush.bf16.msrb.mxu3 %v4390_v59  ;;  %v1524_v4 = vpop.f32.mrf.mxu3  ;;  %v4422_v52 = vld [vmem:[%s5990_s4 + $0x398] sm:$0xff]  ;;  %v4427_v59 = vld [vmem:[%s5990_s4 + $0x3c0] sm:$0xff] }
 0x79e   :  { %v1615_v6 = vpop.f32.mrf.mxu2 }
 0x79f   :  { %2874 = vmatpush.bf16.msrb.mxu2 %v4416_v51  ;;  %2852 = vmatpush.bf16.msra.mxu0 %v4396_v1  ;;  %v1587_v8 = vpop.f32.mrf.mxu0  ;;  %v1251_v51 = vperm.slane %v5765_v11, 6  ;;  %v4419_v11 = vld [vmem:[%s5990_s4 + $0x380] sm:$0xff] }
 0x7a0   :  { %v1588_v10 = vadd.f32 %v1587_v8, %v1248_v2 }
 0x7a1   :  { %2860 = vmatpush.bf16.msrb.mxu1 %v4409_v63  ;;  %2838 = vmatpush.bf16.msrb.mxu3 %v4389_v55 }
 0x7a2   :  { %v1654_v17 = vmax.f32 %v1588_v10, 0.0 }
 0x7a3   :  { %2875 = vmatpush.bf16.msrb.mxu2 %v4415_v3  ;;  %2853 = vmatpush.bf16.msra.mxu0 %v4395_v9 }
 0x7a4   :  { %v1670_v20 = vpack.c.bf16 %v1654_v17, %v1654_v17 }
 0x7a5   :  { %2861 = vmatpush.bf16.msrb.mxu1 %v4408_v7  ;;  %2839 = vmatpush.bf16.msrb.mxu3 %v4388_v15  ;;  %v1574_v24 = vpop.f32.mrf.mxu3 }
 0x7a6   :  { %v1575_v26 = vadd.f32 %v1574_v24, %v1247_v18  ;;  %2854 = vmatmul.bf16.vlgmr.msra.gmra.mxu0 %v1670_v20 }
 0x7a7   :  { %2876 = vmatpush.bf16.msrb.mxu2 %v4414_v12  ;;  %2898 = vmatpush.bf16.msrb.mxu0 %v4434_v14  ;;  %v1589_v29 = vpop.f32.mrf.mxu0 }
 0x7a8   :  { %v1653_v31 = vmax.f32 %v1575_v26, 0.0 }
 0x7a9   :  { %2862 = vmatpush.bf16.msrb.mxu1 %v4407_v19  ;;  %2840 = vmatpush.bf16.msrb.mxu3 %v4387_v25 }
 0x7aa   :  { %v1669_v60 = vpack.c.bf16 %v1653_v31, %v1653_v31 }
 0x7ab   :  { %2877 = vmatpush.bf16.msrb.mxu2 %v4413_v23  ;;  %2899 = vmatpush.bf16.msrb.mxu0 %v4433_v5 }
 0x7ac   :  { %2841 = vmatmul.bf16.vlgmr.msrb.gmra.mxu3 %v1669_v60 }
 0x7ad   :  { %2863 = vmatpush.bf16.msrb.mxu1 %v4406_v27  ;;  %2885 = vmatpush.bf16.msra.mxu3 %v4426_v28  ;;  %v1576_v42 = vpop.f32.mrf.mxu3 }
 0x7af   :  { %2878 = vmatpush.bf16.msrb.mxu2 %v4412_v32  ;;  %2900 = vmatpush.bf16.msrb.mxu0 %v4432_v34  ;;  %v1639_v40 = vpop.f32.mrf.mxu0 }
 0x7b0   :  { %v1640_v57 = vadd.f32 %v1639_v40, %v1252_v49 }
 0x7b1   :  { %2864 = vmatpush.bf16.msrb.mxu1 %v4405_v36  ;;  %2886 = vmatpush.bf16.msra.mxu3 %v4425_v37 }
 0x7b2   :  { %v1658_v61 = vmax.f32 %v1640_v57, 0.0 }
 0x7b3   :  { %2879 = vmatpush.bf16.msrb.mxu2 %v4411_v39  ;;  %2901 = vmatpush.bf16.msrb.mxu0 %v4431_v41 }
 0x7b4   :  { %v1674_v2 = vpack.c.bf16 %v1658_v61, %v1658_v61 }
 0x7b5   :  { %2865 = vmatpush.bf16.msrb.mxu1 %v4404_v43  ;;  %2887 = vmatpush.bf16.msra.mxu3 %v4424_v44  ;;  %v1626_v50 = vpop.f32.mrf.mxu3 }
 0x7b6   :  { %2880 = vmatmul.bf16.vlgmr.msrb.gmra.mxu2 %v1672_v46  ;;  %v1627_v1 = vadd.f32 %v1626_v50, %v1251_v51 }
 0x7b7   :  { %2902 = vmatpush.bf16.msrb.mxu0 %v4430_v45  ;;  %v1641_v54 = vpop.f32.mrf.mxu0 }
 0x7b8   :  { %v1657_v3 = vmax.f32 %v1627_v1, 0.0  ;;  %v4444_v1 = vld [vmem:[%s5988_s5 + $0x1c] ss:$0 sm:$0xff] }
 0x7b9   :  { %2866 = vmatpush.bf16.msrb.mxu1 %v4403_v47  ;;  %2888 = vmatpush.bf16.msra.mxu3 %v4423_v30 }
 0x7ba   :  { %v1673_v4 = vpack.c.bf16 %v1657_v3, %v1657_v3  ;;  %v4152_v3 = vld [vmem:[%s5989_s3 + $0x100] sm:$0xf] }
 0x7bb   :  { %2903 = vmatpush.bf16.msrb.mxu0 %v4429_v38 }
 0x7bc   :  { %2867 = vmatmul.bf16.vlgmr.msrb.gmra.mxu1 %v1671_v53 }
 0x7bd   :  { %2889 = vmatpush.bf16.msra.mxu3 %v4422_v52  ;;  %v1628_v63 = vpop.f32.mrf.mxu3 }
 0x7bf   :  { %2904 = vmatpush.bf16.msrb.mxu0 %v4428_v56 }
 0x7c1   :  { %2890 = vmatpush.bf16.msra.mxu3 %v4421_v58 }
 0x7c3   :  { %2905 = vmatpush.bf16.msrb.mxu0 %v4427_v59 }
 0x7c5   :  { %2891 = vmatpush.bf16.msra.mxu3 %v4420_v0 }
 0x7c6   :  { %2906 = vmatmul.bf16.vlgmr.msrb.gmra.mxu0 %v1674_v2 }
 0x7c9   :  { %2892 = vmatpush.bf16.msra.mxu3 %v4419_v11 }
 0x7cc   :  { %2893 = vmatmul.bf16.vlgmr.msra.gmra.mxu3 %v1673_v4  ;;  %v4436_v4 = vld [vmem:[%s5989_s3 + $0x154] sm:$0xf0] }
 0x7f9   :  { %v2712_v55 = vpop.f32.mrf.mxu1  ;;  %v2725_v6 = vpop.f32.mrf.mxu2 }
 0x7fa   :  { %v2713_v25 = vadd.f32 %v4443_v62, %v2712_v55  ;;  %v4148_v55 = vld [vmem:[%s5989_s3 + $0x50] sm:$0xf] }
 0x7fc   :  { %v2726_v29 = vadd.f32 %v2725_v6, %v2713_v25 }
 0x801   :  { %v2714_v7 = vpop.f32.mrf.mxu1  ;;  %v2727_v8 = vpop.f32.mrf.mxu2 }
 0x802   :  { %v4153_v7 = vor.u32 %v4436_v4, %v4152_v3  ;;  %v4435_v8 = vld [vmem:[%s5989_s3 + $0xa4] sm:$0xf0] }
 0x803   :  { %v2751_v9 = vpop.f32.mrf.mxu0 }
 0x804   :  { %2993 = vmatpush.bf16.msra.mxu1 %v4153_v7 }
 0x809   :  { %v2764_v10 = vpop.f32.mrf.mxu1  ;;  %v2777_v12 = vpop.f32.mrf.mxu2 }
 0x80b   :  { %v2753_v14 = vpop.f32.mrf.mxu0 }
 0x80f   :  { %v2738_v15 = vpop.f32.mrf.mxu3 }
 0x810   :  { %v2739_v32 = vadd.f32 %v2738_v15, %v2726_v29 }
 0x811   :  { %v2766_v17 = vpop.f32.mrf.mxu1  ;;  %v2779_v18 = vpop.f32.mrf.mxu2 }
 0x812   :  { %v2752_v35 = vadd.f32 %v2751_v9, %v2739_v32 }
 0x813   :  { %v2803_v19 = vpop.f32.mrf.mxu0 }
 0x814   :  { %v2765_v36 = vadd.f32 %v2764_v10, %v2752_v35  ;;  %v4149_v10 = vor.u32 %v4435_v8, %v4148_v55 }
 0x816   :  { %v2778_v21 = vadd.f32 %v2777_v12, %v2765_v36  ;;  %2994 = vmatpush.bf16.msra.mxu1 %v4149_v10 }
 0x817   :  { %v2740_v20 = vpop.f32.mrf.mxu3 }
 0x819   :  { %v2829_v23 = vpop.f32.mrf.mxu2  ;;  %v2816_v5 = vpop.f32.mrf.mxu1 }
 0x81b   :  { %v2805_v24 = vpop.f32.mrf.mxu0 }
 0x81f   :  { %v2790_v26 = vpop.f32.mrf.mxu3 }
 0x820   :  { %v2791_v39 = vadd.f32 %v2790_v26, %v2778_v21 }
 0x821   :  { %v2831_v27 = vpop.f32.mrf.mxu2  ;;  %v2818_v28 = vpop.f32.mrf.mxu1 }
 0x822   :  { %v2804_v42 = vadd.f32 %v2803_v19, %v2791_v39  ;;  %v4446_v28 = vld [vmem:[%s5988_s5 + $0x18] ss:$0 sm:$0xff] }
 0x823   :  { %v2855_v31 = vpop.f32.mrf.mxu0 }
 0x824   :  { %v2817_v44 = vadd.f32 %v2816_v5, %v2804_v42 }
 0x826   :  { %v2830_v45 = vadd.f32 %v2829_v23, %v2817_v44 }
 0x827   :  { %v2792_v34 = vpop.f32.mrf.mxu3 }
 0x82b   :  { %v2857_v60 = vpop.f32.mrf.mxu0 }
 0x82f   :  { %v2842_v37 = vpop.f32.mrf.mxu3 }
 0x830   :  { %v2843_v47 = vadd.f32 %v2842_v37, %v2830_v45 }
 0x832   :  { %v2856_v30 = vadd.f32 %v2855_v31, %v2843_v47 }
 0x837   :  { %v2844_v43 = vpop.f32.mrf.mxu3 }
 0x839   :  { %v2868_v41 = vpop.f32.mrf.mxu1  ;;  %v2881_v13 = vpop.f32.mrf.mxu2 }
 0x83a   :  { %v2869_v48 = vadd.f32 %v2868_v41, %v2856_v30 }
 0x83c   :  { %v2882_v49 = vadd.f32 %v2881_v13, %v2869_v48 }
 0x841   :  { %v2870_v22 = vpop.f32.mrf.mxu1  ;;  %v2883_v40 = vpop.f32.mrf.mxu2 }
 0x843   :  { %v2907_v46 = vpop.f32.mrf.mxu0 }
 0x84b   :  { %v2909_v38 = vpop.f32.mrf.mxu0 }
 0x84f   :  { %v2894_v50 = vpop.f32.mrf.mxu3 }
 0x850   :  { %v2895_v52 = vadd.f32 %v2894_v50, %v2882_v49 }
 0x852   :  { %v2908_v53 = vadd.f32 %v2907_v46, %v2895_v52 }
 0x854   :  { %2912 = vrot.lane.b32.xlu0 %v2908_v53, %s4458_s2 }
 0x857   :  { %v2896_v54 = vpop.f32.mrf.mxu3 }
 0x85c   :  { %2950 = vrot.lane.b32.xlu0 %v4444_v1, %s4458_s2 }
 0x8c6   :  { %v2913_v56 = vpop.permute.xlu0 %2912 }
 0x8c7   :  { %v2915_v57 = vadd.f32 %v2913_v56, %v5344_v16  ;;  %v4445_v16 = vld [vmem:[%s5988_s5 + $0x1d] ss:$0 sm:$0xff] }
 0x8c9   :  { %2919 = vrot.lane.b32.xlu2 %v2915_v57, %s4457_s7 }
 0x8ce   :  { %v2951_v5 = vpop.permute.xlu0 %2950 }
 0x923   :  { %v2920_v58 = vpop.permute.xlu2 %2919 }
 0x924   :  { %v2922_v51 = vsel %vm687_vm0, %v2920_v58, 0.0 }
 0x925   :  { %2923 = vadd.xlane.f32.xlu1 %v2922_v51 }
 0x998   :  { %v2924_v59 = vpop.xlane.xlu1 %2923 }
 0x999   :  { %v2925_v61 = vmul.f32 %v2924_v59, %v5282_v33 }
 0x99b   :  { %v2926_v63 = vsub.f32 %v2915_v57, %v2925_v61 }
 0x99d   :  { %v2927_v0 = vmul.f32 %v2926_v63, %v2926_v63 }
 0x99f   :  { %2929 = vrot.lane.b32.xlu2 %v2927_v0, %s4457_s7 }
 0x9a7   :  { %2956 = vrot.lane.b32.xlu2 %v4445_v16, %s4458_s2 }
 0x9f9   :  { %v2930_v2 = vpop.permute.xlu2 %2929 }
 0x9fa   :  { %v2932_v11 = vsel %vm687_vm0, %v2930_v2, 0.0 }
 0x9fb   :  { %2933 = vadd.xlane.f32.xlu1 %v2932_v11 }
 0xa01   :  { %v2957_v24 = vpop.permute.xlu2 %2956 }
 0xa6e   :  { %v2934_v6 = vpop.xlane.xlu1 %2933 }
 0xa6f   :  { %v2935_v9 = vmul.f32 %v2934_v6, %v5282_v33 }
 0xa71   :  { %v2936_v12 = vadd.f32 1e-05, %v2935_v9 }
 0xa73   :  { %4455 = vrsqrt.f32 %v2936_v12  ;;  %vm2943_vm10 = vweird.f32 %v2936_v12 }
 0xa79   :  { %v4456_v14 = vpop.eup %4455 }
 0xa7a   :  { %v2938_v15 = vmul.f32 %v4456_v14, %v2936_v12  ;;  %vm2944_vm9 = vweird.f32 %v4456_v14 }
 0xa7b   :  { %vm2945_vm11 = vmor %vm2943_vm10, %vm2944_vm9 }
 0xa7c   :  { %v2939_v17 = vmul.f32 %v4456_v14, %v2938_v15 }
 0xa7e   :  { %v2940_v18 = vmul.f32 0.5, %v2939_v17 }
 0xa80   :  { %v2941_v19 = vsub.f32 1.5, %v2940_v18 }
 0xa82   :  { %v2942_v20 = vmul.f32 %v4456_v14, %v2941_v19 }
 0xa84   :  { %v2946_v23 = vsel %vm2945_vm11, %v4456_v14, %v2942_v20 }
 0xa85   :  { %v2947_v62 = vmul.f32 %v2946_v23, %v2926_v63 }
 0xa87   :  { %v2953_v25 = vmul.f32 %v2951_v5, %v2947_v62 }
 0xa89   :  { %v2959_v33 = vadd.f32 %v2957_v24, %v2953_v25 }
 0xa8b   :  { %v2960_v26 = vpack.c.bf16 %v2959_v33, %v2959_v33 }
 0xa8d   :  { %2970 = vrot.lane.b32.xlu1 %v2960_v26, %s4457_s7 }
 0xaff   :  { %v2971_v27 = vpop.permute.xlu1 %2970 }
 0xb00   :  { %4154 = vmatmul.msk.bf16.vlgmr.msra.gmra.mxu1 %vm687_vm0, %v2971_v27 }
 0xb7d   :  { %v2996_v29 = vpop.f32.mrf.mxu1 }
 0xb7e   :  { %v2997_v31 = vadd.f32 %v4446_v28, %v2996_v29 }
 0xb80   :  { %3000 = vst [vmem:[%s5991_s6] sm:$0xff] %v2997_v31 }
 0xb85   :  { %v2998_v32 = vpop.f32.mrf.mxu1 }

</bundles_post_ra>
